<compile_context>
chip_gen: v5e
topology: v5e:2x2
jax: 0.10.0
libtpu: 0.0.40
codegen_flags: <defaults>
</compile_context>

<pallas_src>
import functools

import jax
import jax.numpy as jnp
from jax.experimental import pallas as pl
from jax.experimental.pallas import tpu as pltpu

_SSIM_C1 = 0.01 ** 2
_SSIM_C2 = 0.03 ** 2
_ROBUST_EPS = 0.01  # robust_l1 eps (q = 0.5 -> sqrt)


def _photo_ssim_kernel(inp_ref, out_img_ref, *rest, use_exp_mask, C, H, W):
    """One grid step == one batch element.

    inp_ref / out_img_ref : (1, C, H+2, W+2) zero-padded target / warped planes.
    optional em_ref       : (1, 1, H, W) explainability mask.
    o_ref                 : (1, 2, 128); row 0 = sum(sqrt(diff^2+eps)),
                            row 1 = sum(ssim_loss), broadcast across lanes.
    """
    if use_exp_mask:
        em_ref, o_ref = rest
    else:
        (o_ref,) = rest

    # out_of_bound = 1 - "all channels of input are exactly zero" (un-padded centre).
    all_zero = inp_ref[0, 0, 1:1 + H, 1:1 + W] == 0.0
    for c in range(1, C):
        all_zero = jnp.logical_and(all_zero, inp_ref[0, c, 1:1 + H, 1:1 + W] == 0.0)
    oob = 1.0 - all_zero.astype(jnp.float32)                       # (H, W)

    em = em_ref[0, 0, :, :].astype(jnp.float32) if use_exp_mask else None

    robust_map = jnp.zeros((H, W), jnp.float32)
    ssim_loss_map = jnp.zeros((H, W), jnp.float32)
    inv9 = 1.0 / 9.0

    for c in range(C):
        sum_x = jnp.zeros((H, W), jnp.float32)
        sum_y = jnp.zeros((H, W), jnp.float32)
        sum_xx = jnp.zeros((H, W), jnp.float32)
        sum_yy = jnp.zeros((H, W), jnp.float32)
        sum_xy = jnp.zeros((H, W), jnp.float32)
        x_c = None
        y_c = None
        # 3x3 box statistics via 9 statically shifted reads of the padded refs.
        for di in range(3):
            for dj in range(3):
                xw = out_img_ref[0, c, di:di + H, dj:dj + W].astype(jnp.float32)
                yw = inp_ref[0, c, di:di + H, dj:dj + W].astype(jnp.float32)
                if di == 1 and dj == 1:        # centre window == original plane
                    x_c, y_c = xw, yw
                sum_x = sum_x + xw
                sum_y = sum_y + yw
                sum_xx = sum_xx + xw * xw
                sum_yy = sum_yy + yw * yw
                sum_xy = sum_xy + xw * yw

        mu_x = sum_x * inv9
        mu_y = sum_y * inv9
        sigma_x = sum_xx * inv9 - mu_x * mu_x
        sigma_y = sum_yy * inv9 - mu_y * mu_y
        sigma_xy = sum_xy * inv9 - mu_x * mu_y

        ssim_map = ((2.0 * mu_x * mu_y + _SSIM_C1) * (2.0 * sigma_xy + _SSIM_C2)) / (
            (mu_x * mu_x + mu_y * mu_y + _SSIM_C1) * (sigma_x + sigma_y + _SSIM_C2))

        ssim_l = 1.0 - ssim_map * oob
        diff = (x_c - y_c) * oob
        if use_exp_mask:
            diff = diff * em
            ssim_l = ssim_l * em

        robust_map = robust_map + jnp.sqrt(diff * diff + _ROBUST_EPS)
        ssim_loss_map = ssim_loss_map + ssim_l

    robust_sum = jnp.sum(robust_map)   # one cross-lane reduction per scalar per step
    ssim_sum = jnp.sum(ssim_loss_map)
    o_ref[0, 0:1, :] = jnp.full((1, 128), robust_sum, dtype=jnp.float32)
    o_ref[0, 1:2, :] = jnp.full((1, 128), ssim_sum, dtype=jnp.float32)


def _adaptive_avg_pool2d(x, out_hw):
    """torch.nn.functional.adaptive_avg_pool2d for identity / integer-factor cases."""
    B, C, H, W = x.shape
    h, w = out_hw
    if (H, W) == (h, w):
        return x
    if H % h == 0 and W % w == 0:
        return x.reshape(B, C, h, H // h, w, W // w).mean(axis=(3, 5))
    # TODO(synk): general (non-divisible) adaptive_avg_pool2d binning not ported.
    raise NotImplementedError("adaptive_avg_pool2d with non-divisible output size")


def photometric_reconstruction_loss_with_ssim(input_img, output_img, exp_mask=None,
                                              pose_vec_weight=None, validate=False):
    """JAX/Pallas equivalent of the PyTorch module's forward (default path)."""
    if pose_vec_weight is not None or validate:
        # TODO(synk): pose_vec_weight / validate branches (CPU numpy round-trip +
        # gradient mask re-weighting) are not ported to the Pallas path.
        raise NotImplementedError("pose_vec_weight / validate paths not implemented")

    B, C, H, W = input_img.shape
    output_img = _adaptive_avg_pool2d(output_img, (H, W))

    # Zero 'SAME' padding for the 3x3 SSIM window (one-time, tiny vs kernel work).
    pad = ((0, 0), (0, 0), (1, 1), (1, 1))
    inp_p = jnp.pad(input_img.astype(jnp.float32), pad)
    out_p = jnp.pad(output_img.astype(jnp.float32), pad)

    use_em = exp_mask is not None

    in_specs = [
        pl.BlockSpec((1, C, H + 2, W + 2), lambda b: (b, 0, 0, 0)),
        pl.BlockSpec((1, C, H + 2, W + 2), lambda b: (b, 0, 0, 0)),
    ]
    args = [inp_p, out_p]
    if use_em:
        em = jnp.broadcast_to(exp_mask, (B, 1, H, W)).astype(jnp.float32)
        in_specs.append(pl.BlockSpec((1, 1, H, W), lambda b: (b, 0, 0, 0)))
        args.append(em)

    kernel = functools.partial(_photo_ssim_kernel, use_exp_mask=use_em, C=C, H=H, W=W)

    partials = pl.pallas_call(
        kernel,
        out_shape=jax.ShapeDtypeStruct((B, 2, 128), jnp.float32),
        grid_spec=pltpu.PrefetchScalarGridSpec(
            num_scalar_prefetch=0,
            grid=(B,),
            in_specs=in_specs,
            out_specs=pl.BlockSpec((1, 2, 128), lambda b: (b, 0, 0)),
        ),
        compiler_params=pltpu.CompilerParams(
            dimension_semantics=("parallel",)),   # batch blocks are independent (v7x megacore)
    )(*args)

    n = jnp.float32(B * C * H * W)
    robust_mean = jnp.sum(partials[:, 0, 0]) / n
    ssim_mean = jnp.sum(partials[:, 1, 0]) / n
    return 0.5 * (robust_mean + 0.5 * ssim_mean)


# ------------------------- pure-JAX reference (for the self-check) -------------------------

def _ssim_map_ref(x, y):
    H, W = x.shape[2], x.shape[3]
    pad = ((0, 0), (0, 0), (1, 1), (1, 1))
    xp = jnp.pad(x, pad)
    yp = jnp.pad(y, pad)
    sum_x = sum_y = sum_xx = sum_yy = sum_xy = 0.0
    for di in range(3):
        for dj in range(3):
            xw = xp[:, :, di:di + H, dj:dj + W]
            yw = yp[:, :, di:di + H, dj:dj + W]
            sum_x = sum_x + xw
            sum_y = sum_y + yw
            sum_xx = sum_xx + xw * xw
            sum_yy = sum_yy + yw * yw
            sum_xy = sum_xy + xw * yw
    inv9 = 1.0 / 9.0
    mu_x = sum_x * inv9
    mu_y = sum_y * inv9
    sigma_x = sum_xx * inv9 - mu_x * mu_x
    sigma_y = sum_yy * inv9 - mu_y * mu_y
    sigma_xy = sum_xy * inv9 - mu_x * mu_y
    return ((2.0 * mu_x * mu_y + _SSIM_C1) * (2.0 * sigma_xy + _SSIM_C2)) / (
        (mu_x * mu_x + mu_y * mu_y + _SSIM_C1) * (sigma_x + sigma_y + _SSIM_C2))


def _loss_ref(input_img, output_img, exp_mask=None):
    B, C, H, W = input_img.shape
    output_img = _adaptive_avg_pool2d(output_img, (H, W))
    oob = 1.0 - jnp.all(input_img == 0.0, axis=1, keepdims=True).astype(jnp.float32)
    ssim_loss = 1.0 - _ssim_map_ref(output_img, input_img) * oob
    diff = (output_img - input_img) * oob
    if exp_mask is not None:
        diff = diff * exp_mask
        ssim_loss = ssim_loss * exp_mask
    robust = jnp.mean(jnp.sqrt(diff * diff + _ROBUST_EPS))
    return 0.5 * (robust + 0.5 * jnp.mean(ssim_loss))


if __name__ == "__main__":
    key = jax.random.PRNGKey(0)
    k1, k2, k3 = jax.random.split(key, 3)

    B, C, H, W = 2, 3, 16, 16
    input_img = jax.random.uniform(k1, (B, C, H, W), jnp.float32)
    # Some exactly-zero pixels across all channels -> exercises out_of_bound.
    input_img = input_img.at[:, :, :3, :4].set(0.0)
    # Warped/predicted image at 2x resolution -> exercises adaptive_avg_pool2d.
    output_img = jax.random.uniform(k2, (B, C, 2 * H, 2 * W), jnp.float32)
    exp_mask = jax.random.uniform(k3, (B, 1, H, W), jnp.float32, minval=0.1, maxval=1.0)

    loss = photometric_reconstruction_loss_with_ssim(input_img, output_img, exp_mask=exp_mask)
    loss = jax.block_until_ready(loss)

    ref = jax.block_until_ready(_loss_ref(input_img, output_img, exp_mask=exp_mask))

    assert bool(jnp.isfinite(loss)), loss
    assert jnp.allclose(loss, ref, rtol=1e-4, atol=1e-4), (loss, ref)
    print("KERNEL_OK")
</pallas_src>

<mosaic_0001>
module attributes {stable_mosaic.version = 11 : i64} {
  func.func @_photo_ssim_kernel(%arg0: i32, %arg1: memref<1x3x18x18xf32, #tpu.memory_space<vmem>>, %arg2: memref<1x3x18x18xf32, #tpu.memory_space<vmem>>, %arg3: memref<1x1x16x16xf32, #tpu.memory_space<vmem>>, %arg4: memref<1x2x128xf32, #tpu.memory_space<vmem>>) attributes {dimension_semantics = [#tpu.dimension_semantics<parallel>], iteration_bounds = array<i64: 2>, scalar_prefetch = 0 : i64, scratch_operands = 0 : i64, tpu.core_type = #tpu.core_type<tc>, window_params = [{transform_indices = @transform_0, window_bounds = array<i64: 1, 3, 18, 18>}, {transform_indices = @transform_1, window_bounds = array<i64: 1, 3, 18, 18>}, {transform_indices = @transform_2, window_bounds = array<i64: 1, 1, 16, 16>}, {transform_indices = @transform_3, window_bounds = array<i64: 1, 2, 128>}]} {
    %c0 = arith.constant 0 : index
    %c0_0 = arith.constant 0 : index
    %c1 = arith.constant 1 : index
    %c1_1 = arith.constant 1 : index
    %0 = vector.load %arg1[%c0, %c0_0, %c1, %c1_1] : memref<1x3x18x18xf32, #tpu.memory_space<vmem>>, vector<1x1x16x16xf32>
    %1 = vector.shape_cast %0 : vector<1x1x16x16xf32> to vector<16x16xf32>
    %cst = arith.constant 0.000000e+00 : f32
    %2 = vector.broadcast %cst : f32 to vector<16x16xf32>
    %3 = arith.cmpf oeq, %1, %2 : vector<16x16xf32>
    %c0_2 = arith.constant 0 : index
    %c1_3 = arith.constant 1 : index
    %c1_4 = arith.constant 1 : index
    %c1_5 = arith.constant 1 : index
    %4 = vector.load %arg1[%c0_2, %c1_3, %c1_4, %c1_5] : memref<1x3x18x18xf32, #tpu.memory_space<vmem>>, vector<1x1x16x16xf32>
    %5 = vector.shape_cast %4 : vector<1x1x16x16xf32> to vector<16x16xf32>
    %cst_6 = arith.constant 0.000000e+00 : f32
    %6 = vector.broadcast %cst_6 : f32 to vector<16x16xf32>
    %7 = arith.cmpf oeq, %5, %6 : vector<16x16xf32>
    %8 = arith.andi %3, %7 : vector<16x16xi1>
    %c0_7 = arith.constant 0 : index
    %c2 = arith.constant 2 : index
    %c1_8 = arith.constant 1 : index
    %c1_9 = arith.constant 1 : index
    %9 = vector.load %arg1[%c0_7, %c2, %c1_8, %c1_9] : memref<1x3x18x18xf32, #tpu.memory_space<vmem>>, vector<1x1x16x16xf32>
    %10 = vector.shape_cast %9 : vector<1x1x16x16xf32> to vector<16x16xf32>
    %cst_10 = arith.constant 0.000000e+00 : f32
    %11 = vector.broadcast %cst_10 : f32 to vector<16x16xf32>
    %12 = arith.cmpf oeq, %10, %11 : vector<16x16xf32>
    %13 = arith.andi %8, %12 : vector<16x16xi1>
    %14 = arith.extui %13 : vector<16x16xi1> to vector<16x16xi32>
    %15 = arith.sitofp %14 : vector<16x16xi32> to vector<16x16xf32>
    %cst_11 = arith.constant 1.000000e+00 : f32
    %16 = vector.broadcast %cst_11 : f32 to vector<16x16xf32>
    %17 = arith.subf %16, %15 : vector<16x16xf32>
    %c0_12 = arith.constant 0 : index
    %c0_13 = arith.constant 0 : index
    %c0_14 = arith.constant 0 : index
    %c0_15 = arith.constant 0 : index
    %18 = vector.load %arg3[%c0_12, %c0_13, %c0_14, %c0_15] : memref<1x1x16x16xf32, #tpu.memory_space<vmem>>, vector<1x1x16x16xf32>
    %19 = vector.shape_cast %18 : vector<1x1x16x16xf32> to vector<16x16xf32>
    %cst_16 = arith.constant 0.000000e+00 : f32
    %20 = vector.broadcast %cst_16 : f32 to vector<16x16xf32>
    %cst_17 = arith.constant 0.000000e+00 : f32
    %21 = vector.broadcast %cst_17 : f32 to vector<16x16xf32>
    %cst_18 = arith.constant 0.000000e+00 : f32
    %22 = vector.broadcast %cst_18 : f32 to vector<16x16xf32>
    %cst_19 = arith.constant 0.000000e+00 : f32
    %23 = vector.broadcast %cst_19 : f32 to vector<16x16xf32>
    %cst_20 = arith.constant 0.000000e+00 : f32
    %24 = vector.broadcast %cst_20 : f32 to vector<16x16xf32>
    %cst_21 = arith.constant 0.000000e+00 : f32
    %25 = vector.broadcast %cst_21 : f32 to vector<16x16xf32>
    %cst_22 = arith.constant 0.000000e+00 : f32
    %26 = vector.broadcast %cst_22 : f32 to vector<16x16xf32>
    %c0_23 = arith.constant 0 : index
    %c0_24 = arith.constant 0 : index
    %c0_25 = arith.constant 0 : index
    %c0_26 = arith.constant 0 : index
    %27 = vector.load %arg2[%c0_23, %c0_24, %c0_25, %c0_26] : memref<1x3x18x18xf32, #tpu.memory_space<vmem>>, vector<1x1x16x16xf32>
    %28 = vector.shape_cast %27 : vector<1x1x16x16xf32> to vector<16x16xf32>
    %c0_27 = arith.constant 0 : index
    %c0_28 = arith.constant 0 : index
    %c0_29 = arith.constant 0 : index
    %c0_30 = arith.constant 0 : index
    %29 = vector.load %arg1[%c0_27, %c0_28, %c0_29, %c0_30] : memref<1x3x18x18xf32, #tpu.memory_space<vmem>>, vector<1x1x16x16xf32>
    %30 = vector.shape_cast %29 : vector<1x1x16x16xf32> to vector<16x16xf32>
    %31 = arith.addf %22, %28 : vector<16x16xf32>
    %32 = arith.addf %23, %30 : vector<16x16xf32>
    %33 = arith.mulf %28, %28 : vector<16x16xf32>
    %34 = arith.addf %24, %33 : vector<16x16xf32>
    %35 = arith.mulf %30, %30 : vector<16x16xf32>
    %36 = arith.addf %25, %35 : vector<16x16xf32>
    %37 = arith.mulf %28, %30 : vector<16x16xf32>
    %38 = arith.addf %26, %37 : vector<16x16xf32>
    %c0_31 = arith.constant 0 : index
    %c0_32 = arith.constant 0 : index
    %c0_33 = arith.constant 0 : index
    %c1_34 = arith.constant 1 : index
    %39 = vector.load %arg2[%c0_31, %c0_32, %c0_33, %c1_34] : memref<1x3x18x18xf32, #tpu.memory_space<vmem>>, vector<1x1x16x16xf32>
    %40 = vector.shape_cast %39 : vector<1x1x16x16xf32> to vector<16x16xf32>
    %c0_35 = arith.constant 0 : index
    %c0_36 = arith.constant 0 : index
    %c0_37 = arith.constant 0 : index
    %c1_38 = arith.constant 1 : index
    %41 = vector.load %arg1[%c0_35, %c0_36, %c0_37, %c1_38] : memref<1x3x18x18xf32, #tpu.memory_space<vmem>>, vector<1x1x16x16xf32>
    %42 = vector.shape_cast %41 : vector<1x1x16x16xf32> to vector<16x16xf32>
    %43 = arith.addf %31, %40 : vector<16x16xf32>
    %44 = arith.addf %32, %42 : vector<16x16xf32>
    %45 = arith.mulf %40, %40 : vector<16x16xf32>
    %46 = arith.addf %34, %45 : vector<16x16xf32>
    %47 = arith.mulf %42, %42 : vector<16x16xf32>
    %48 = arith.addf %36, %47 : vector<16x16xf32>
    %49 = arith.mulf %40, %42 : vector<16x16xf32>
    %50 = arith.addf %38, %49 : vector<16x16xf32>
    %c0_39 = arith.constant 0 : index
    %c0_40 = arith.constant 0 : index
    %c0_41 = arith.constant 0 : index
    %c2_42 = arith.constant 2 : index
    %51 = vector.load %arg2[%c0_39, %c0_40, %c0_41, %c2_42] : memref<1x3x18x18xf32, #tpu.memory_space<vmem>>, vector<1x1x16x16xf32>
    %52 = vector.shape_cast %51 : vector<1x1x16x16xf32> to vector<16x16xf32>
    %c0_43 = arith.constant 0 : index
    %c0_44 = arith.constant 0 : index
    %c0_45 = arith.constant 0 : index
    %c2_46 = arith.constant 2 : index
    %53 = vector.load %arg1[%c0_43, %c0_44, %c0_45, %c2_46] : memref<1x3x18x18xf32, #tpu.memory_space<vmem>>, vector<1x1x16x16xf32>
    %54 = vector.shape_cast %53 : vector<1x1x16x16xf32> to vector<16x16xf32>
    %55 = arith.addf %43, %52 : vector<16x16xf32>
    %56 = arith.addf %44, %54 : vector<16x16xf32>
    %57 = arith.mulf %52, %52 : vector<16x16xf32>
    %58 = arith.addf %46, %57 : vector<16x16xf32>
    %59 = arith.mulf %54, %54 : vector<16x16xf32>
    %60 = arith.addf %48, %59 : vector<16x16xf32>
    %61 = arith.mulf %52, %54 : vector<16x16xf32>
    %62 = arith.addf %50, %61 : vector<16x16xf32>
    %c0_47 = arith.constant 0 : index
    %c0_48 = arith.constant 0 : index
    %c1_49 = arith.constant 1 : index
    %c0_50 = arith.constant 0 : index
    %63 = vector.load %arg2[%c0_47, %c0_48, %c1_49, %c0_50] : memref<1x3x18x18xf32, #tpu.memory_space<vmem>>, vector<1x1x16x16xf32>
    %64 = vector.shape_cast %63 : vector<1x1x16x16xf32> to vector<16x16xf32>
    %c0_51 = arith.constant 0 : index
    %c0_52 = arith.constant 0 : index
    %c1_53 = arith.constant 1 : index
    %c0_54 = arith.constant 0 : index
    %65 = vector.load %arg1[%c0_51, %c0_52, %c1_53, %c0_54] : memref<1x3x18x18xf32, #tpu.memory_space<vmem>>, vector<1x1x16x16xf32>
    %66 = vector.shape_cast %65 : vector<1x1x16x16xf32> to vector<16x16xf32>
    %67 = arith.addf %55, %64 : vector<16x16xf32>
    %68 = arith.addf %56, %66 : vector<16x16xf32>
    %69 = arith.mulf %64, %64 : vector<16x16xf32>
    %70 = arith.addf %58, %69 : vector<16x16xf32>
    %71 = arith.mulf %66, %66 : vector<16x16xf32>
    %72 = arith.addf %60, %71 : vector<16x16xf32>
    %73 = arith.mulf %64, %66 : vector<16x16xf32>
    %74 = arith.addf %62, %73 : vector<16x16xf32>
    %c0_55 = arith.constant 0 : index
    %c0_56 = arith.constant 0 : index
    %c1_57 = arith.constant 1 : index
    %c1_58 = arith.constant 1 : index
    %75 = vector.load %arg2[%c0_55, %c0_56, %c1_57, %c1_58] : memref<1x3x18x18xf32, #tpu.memory_space<vmem>>, vector<1x1x16x16xf32>
    %76 = vector.shape_cast %75 : vector<1x1x16x16xf32> to vector<16x16xf32>
    %c0_59 = arith.constant 0 : index
    %c0_60 = arith.constant 0 : index
    %c1_61 = arith.constant 1 : index
    %c1_62 = arith.constant 1 : index
    %77 = vector.load %arg1[%c0_59, %c0_60, %c1_61, %c1_62] : memref<1x3x18x18xf32, #tpu.memory_space<vmem>>, vector<1x1x16x16xf32>
    %78 = vector.shape_cast %77 : vector<1x1x16x16xf32> to vector<16x16xf32>
    %79 = arith.addf %67, %76 : vector<16x16xf32>
    %80 = arith.addf %68, %78 : vector<16x16xf32>
    %81 = arith.mulf %76, %76 : vector<16x16xf32>
    %82 = arith.addf %70, %81 : vector<16x16xf32>
    %83 = arith.mulf %78, %78 : vector<16x16xf32>
    %84 = arith.addf %72, %83 : vector<16x16xf32>
    %85 = arith.mulf %76, %78 : vector<16x16xf32>
    %86 = arith.addf %74, %85 : vector<16x16xf32>
    %c0_63 = arith.constant 0 : index
    %c0_64 = arith.constant 0 : index
    %c1_65 = arith.constant 1 : index
    %c2_66 = arith.constant 2 : index
    %87 = vector.load %arg2[%c0_63, %c0_64, %c1_65, %c2_66] : memref<1x3x18x18xf32, #tpu.memory_space<vmem>>, vector<1x1x16x16xf32>
    %88 = vector.shape_cast %87 : vector<1x1x16x16xf32> to vector<16x16xf32>
    %c0_67 = arith.constant 0 : index
    %c0_68 = arith.constant 0 : index
    %c1_69 = arith.constant 1 : index
    %c2_70 = arith.constant 2 : index
    %89 = vector.load %arg1[%c0_67, %c0_68, %c1_69, %c2_70] : memref<1x3x18x18xf32, #tpu.memory_space<vmem>>, vector<1x1x16x16xf32>
    %90 = vector.shape_cast %89 : vector<1x1x16x16xf32> to vector<16x16xf32>
    %91 = arith.addf %79, %88 : vector<16x16xf32>
    %92 = arith.addf %80, %90 : vector<16x16xf32>
    %93 = arith.mulf %88, %88 : vector<16x16xf32>
    %94 = arith.addf %82, %93 : vector<16x16xf32>
    %95 = arith.mulf %90, %90 : vector<16x16xf32>
    %96 = arith.addf %84, %95 : vector<16x16xf32>
    %97 = arith.mulf %88, %90 : vector<16x16xf32>
    %98 = arith.addf %86, %97 : vector<16x16xf32>
    %c0_71 = arith.constant 0 : index
    %c0_72 = arith.constant 0 : index
    %c2_73 = arith.constant 2 : index
    %c0_74 = arith.constant 0 : index
    %99 = vector.load %arg2[%c0_71, %c0_72, %c2_73, %c0_74] : memref<1x3x18x18xf32, #tpu.memory_space<vmem>>, vector<1x1x16x16xf32>
    %100 = vector.shape_cast %99 : vector<1x1x16x16xf32> to vector<16x16xf32>
    %c0_75 = arith.constant 0 : index
    %c0_76 = arith.constant 0 : index
    %c2_77 = arith.constant 2 : index
    %c0_78 = arith.constant 0 : index
    %101 = vector.load %arg1[%c0_75, %c0_76, %c2_77, %c0_78] : memref<1x3x18x18xf32, #tpu.memory_space<vmem>>, vector<1x1x16x16xf32>
    %102 = vector.shape_cast %101 : vector<1x1x16x16xf32> to vector<16x16xf32>
    %103 = arith.addf %91, %100 : vector<16x16xf32>
    %104 = arith.addf %92, %102 : vector<16x16xf32>
    %105 = arith.mulf %100, %100 : vector<16x16xf32>
    %106 = arith.addf %94, %105 : vector<16x16xf32>
    %107 = arith.mulf %102, %102 : vector<16x16xf32>
    %108 = arith.addf %96, %107 : vector<16x16xf32>
    %109 = arith.mulf %100, %102 : vector<16x16xf32>
    %110 = arith.addf %98, %109 : vector<16x16xf32>
    %c0_79 = arith.constant 0 : index
    %c0_80 = arith.constant 0 : index
    %c2_81 = arith.constant 2 : index
    %c1_82 = arith.constant 1 : index
    %111 = vector.load %arg2[%c0_79, %c0_80, %c2_81, %c1_82] : memref<1x3x18x18xf32, #tpu.memory_space<vmem>>, vector<1x1x16x16xf32>
    %112 = vector.shape_cast %111 : vector<1x1x16x16xf32> to vector<16x16xf32>
    %c0_83 = arith.constant 0 : index
    %c0_84 = arith.constant 0 : index
    %c2_85 = arith.constant 2 : index
    %c1_86 = arith.constant 1 : index
    %113 = vector.load %arg1[%c0_83, %c0_84, %c2_85, %c1_86] : memref<1x3x18x18xf32, #tpu.memory_space<vmem>>, vector<1x1x16x16xf32>
    %114 = vector.shape_cast %113 : vector<1x1x16x16xf32> to vector<16x16xf32>
    %115 = arith.addf %103, %112 : vector<16x16xf32>
    %116 = arith.addf %104, %114 : vector<16x16xf32>
    %117 = arith.mulf %112, %112 : vector<16x16xf32>
    %118 = arith.addf %106, %117 : vector<16x16xf32>
    %119 = arith.mulf %114, %114 : vector<16x16xf32>
    %120 = arith.addf %108, %119 : vector<16x16xf32>
    %121 = arith.mulf %112, %114 : vector<16x16xf32>
    %122 = arith.addf %110, %121 : vector<16x16xf32>
    %c0_87 = arith.constant 0 : index
    %c0_88 = arith.constant 0 : index
    %c2_89 = arith.constant 2 : index
    %c2_90 = arith.constant 2 : index
    %123 = vector.load %arg2[%c0_87, %c0_88, %c2_89, %c2_90] : memref<1x3x18x18xf32, #tpu.memory_space<vmem>>, vector<1x1x16x16xf32>
    %124 = vector.shape_cast %123 : vector<1x1x16x16xf32> to vector<16x16xf32>
    %c0_91 = arith.constant 0 : index
    %c0_92 = arith.constant 0 : index
    %c2_93 = arith.constant 2 : index
    %c2_94 = arith.constant 2 : index
    %125 = vector.load %arg1[%c0_91, %c0_92, %c2_93, %c2_94] : memref<1x3x18x18xf32, #tpu.memory_space<vmem>>, vector<1x1x16x16xf32>
    %126 = vector.shape_cast %125 : vector<1x1x16x16xf32> to vector<16x16xf32>
    %127 = arith.addf %115, %124 : vector<16x16xf32>
    %128 = arith.addf %116, %126 : vector<16x16xf32>
    %129 = arith.mulf %124, %124 : vector<16x16xf32>
    %130 = arith.addf %118, %129 : vector<16x16xf32>
    %131 = arith.mulf %126, %126 : vector<16x16xf32>
    %132 = arith.addf %120, %131 : vector<16x16xf32>
    %133 = arith.mulf %124, %126 : vector<16x16xf32>
    %134 = arith.addf %122, %133 : vector<16x16xf32>
    %cst_95 = arith.constant 0.111111112 : f32
    %135 = vector.broadcast %cst_95 : f32 to vector<16x16xf32>
    %136 = arith.mulf %127, %135 : vector<16x16xf32>
    %cst_96 = arith.constant 0.111111112 : f32
    %137 = vector.broadcast %cst_96 : f32 to vector<16x16xf32>
    %138 = arith.mulf %128, %137 : vector<16x16xf32>
    %cst_97 = arith.constant 0.111111112 : f32
    %139 = vector.broadcast %cst_97 : f32 to vector<16x16xf32>
    %140 = arith.mulf %130, %139 : vector<16x16xf32>
    %141 = arith.mulf %136, %136 : vector<16x16xf32>
    %142 = arith.subf %140, %141 : vector<16x16xf32>
    %cst_98 = arith.constant 0.111111112 : f32
    %143 = vector.broadcast %cst_98 : f32 to vector<16x16xf32>
    %144 = arith.mulf %132, %143 : vector<16x16xf32>
    %145 = arith.mulf %138, %138 : vector<16x16xf32>
    %146 = arith.subf %144, %145 : vector<16x16xf32>
    %cst_99 = arith.constant 0.111111112 : f32
    %147 = vector.broadcast %cst_99 : f32 to vector<16x16xf32>
    %148 = arith.mulf %134, %147 : vector<16x16xf32>
    %149 = arith.mulf %136, %138 : vector<16x16xf32>
    %150 = arith.subf %148, %149 : vector<16x16xf32>
    %cst_100 = arith.constant 2.000000e+00 : f32
    %151 = vector.broadcast %cst_100 : f32 to vector<16x16xf32>
    %152 = arith.mulf %151, %136 : vector<16x16xf32>
    %153 = arith.mulf %152, %138 : vector<16x16xf32>
    %cst_101 = arith.constant 9.99999974E-5 : f32
    %154 = vector.broadcast %cst_101 : f32 to vector<16x16xf32>
    %155 = arith.addf %153, %154 : vector<16x16xf32>
    %cst_102 = arith.constant 2.000000e+00 : f32
    %156 = vector.broadcast %cst_102 : f32 to vector<16x16xf32>
    %157 = arith.mulf %156, %150 : vector<16x16xf32>
    %cst_103 = arith.constant 8.99999984E-4 : f32
    %158 = vector.broadcast %cst_103 : f32 to vector<16x16xf32>
    %159 = arith.addf %157, %158 : vector<16x16xf32>
    %160 = arith.mulf %155, %159 : vector<16x16xf32>
    %161 = arith.mulf %136, %136 : vector<16x16xf32>
    %162 = arith.mulf %138, %138 : vector<16x16xf32>
    %163 = arith.addf %161, %162 : vector<16x16xf32>
    %cst_104 = arith.constant 9.99999974E-5 : f32
    %164 = vector.broadcast %cst_104 : f32 to vector<16x16xf32>
    %165 = arith.addf %163, %164 : vector<16x16xf32>
    %166 = arith.addf %142, %146 : vector<16x16xf32>
    %cst_105 = arith.constant 8.99999984E-4 : f32
    %167 = vector.broadcast %cst_105 : f32 to vector<16x16xf32>
    %168 = arith.addf %166, %167 : vector<16x16xf32>
    %169 = arith.mulf %165, %168 : vector<16x16xf32>
    %170 = arith.divf %160, %169 : vector<16x16xf32>
    %171 = arith.mulf %170, %17 : vector<16x16xf32>
    %cst_106 = arith.constant 1.000000e+00 : f32
    %172 = vector.broadcast %cst_106 : f32 to vector<16x16xf32>
    %173 = arith.subf %172, %171 : vector<16x16xf32>
    %174 = arith.subf %76, %78 : vector<16x16xf32>
    %175 = arith.mulf %174, %17 : vector<16x16xf32>
    %176 = arith.mulf %175, %19 : vector<16x16xf32>
    %177 = arith.mulf %173, %19 : vector<16x16xf32>
    %178 = arith.mulf %176, %176 : vector<16x16xf32>
    %cst_107 = arith.constant 0.00999999977 : f32
    %179 = vector.broadcast %cst_107 : f32 to vector<16x16xf32>
    %180 = arith.addf %178, %179 : vector<16x16xf32>
    %181 = math.sqrt %180 : vector<16x16xf32>
    %182 = arith.addf %20, %181 : vector<16x16xf32>
    %183 = arith.addf %21, %177 : vector<16x16xf32>
    %cst_108 = arith.constant 0.000000e+00 : f32
    %184 = vector.broadcast %cst_108 : f32 to vector<16x16xf32>
    %cst_109 = arith.constant 0.000000e+00 : f32
    %185 = vector.broadcast %cst_109 : f32 to vector<16x16xf32>
    %cst_110 = arith.constant 0.000000e+00 : f32
    %186 = vector.broadcast %cst_110 : f32 to vector<16x16xf32>
    %cst_111 = arith.constant 0.000000e+00 : f32
    %187 = vector.broadcast %cst_111 : f32 to vector<16x16xf32>
    %cst_112 = arith.constant 0.000000e+00 : f32
    %188 = vector.broadcast %cst_112 : f32 to vector<16x16xf32>
    %c0_113 = arith.constant 0 : index
    %c1_114 = arith.constant 1 : index
    %c0_115 = arith.constant 0 : index
    %c0_116 = arith.constant 0 : index
    %189 = vector.load %arg2[%c0_113, %c1_114, %c0_115, %c0_116] : memref<1x3x18x18xf32, #tpu.memory_space<vmem>>, vector<1x1x16x16xf32>
    %190 = vector.shape_cast %189 : vector<1x1x16x16xf32> to vector<16x16xf32>
    %c0_117 = arith.constant 0 : index
    %c1_118 = arith.constant 1 : index
    %c0_119 = arith.constant 0 : index
    %c0_120 = arith.constant 0 : index
    %191 = vector.load %arg1[%c0_117, %c1_118, %c0_119, %c0_120] : memref<1x3x18x18xf32, #tpu.memory_space<vmem>>, vector<1x1x16x16xf32>
    %192 = vector.shape_cast %191 : vector<1x1x16x16xf32> to vector<16x16xf32>
    %193 = arith.addf %184, %190 : vector<16x16xf32>
    %194 = arith.addf %185, %192 : vector<16x16xf32>
    %195 = arith.mulf %190, %190 : vector<16x16xf32>
    %196 = arith.addf %186, %195 : vector<16x16xf32>
    %197 = arith.mulf %192, %192 : vector<16x16xf32>
    %198 = arith.addf %187, %197 : vector<16x16xf32>
    %199 = arith.mulf %190, %192 : vector<16x16xf32>
    %200 = arith.addf %188, %199 : vector<16x16xf32>
    %c0_121 = arith.constant 0 : index
    %c1_122 = arith.constant 1 : index
    %c0_123 = arith.constant 0 : index
    %c1_124 = arith.constant 1 : index
    %201 = vector.load %arg2[%c0_121, %c1_122, %c0_123, %c1_124] : memref<1x3x18x18xf32, #tpu.memory_space<vmem>>, vector<1x1x16x16xf32>
    %202 = vector.shape_cast %201 : vector<1x1x16x16xf32> to vector<16x16xf32>
    %c0_125 = arith.constant 0 : index
    %c1_126 = arith.constant 1 : index
    %c0_127 = arith.constant 0 : index
    %c1_128 = arith.constant 1 : index
    %203 = vector.load %arg1[%c0_125, %c1_126, %c0_127, %c1_128] : memref<1x3x18x18xf32, #tpu.memory_space<vmem>>, vector<1x1x16x16xf32>
    %204 = vector.shape_cast %203 : vector<1x1x16x16xf32> to vector<16x16xf32>
    %205 = arith.addf %193, %202 : vector<16x16xf32>
    %206 = arith.addf %194, %204 : vector<16x16xf32>
    %207 = arith.mulf %202, %202 : vector<16x16xf32>
    %208 = arith.addf %196, %207 : vector<16x16xf32>
    %209 = arith.mulf %204, %204 : vector<16x16xf32>
    %210 = arith.addf %198, %209 : vector<16x16xf32>
    %211 = arith.mulf %202, %204 : vector<16x16xf32>
    %212 = arith.addf %200, %211 : vector<16x16xf32>
    %c0_129 = arith.constant 0 : index
    %c1_130 = arith.constant 1 : index
    %c0_131 = arith.constant 0 : index
    %c2_132 = arith.constant 2 : index
    %213 = vector.load %arg2[%c0_129, %c1_130, %c0_131, %c2_132] : memref<1x3x18x18xf32, #tpu.memory_space<vmem>>, vector<1x1x16x16xf32>
    %214 = vector.shape_cast %213 : vector<1x1x16x16xf32> to vector<16x16xf32>
    %c0_133 = arith.constant 0 : index
    %c1_134 = arith.constant 1 : index
    %c0_135 = arith.constant 0 : index
    %c2_136 = arith.constant 2 : index
    %215 = vector.load %arg1[%c0_133, %c1_134, %c0_135, %c2_136] : memref<1x3x18x18xf32, #tpu.memory_space<vmem>>, vector<1x1x16x16xf32>
    %216 = vector.shape_cast %215 : vector<1x1x16x16xf32> to vector<16x16xf32>
    %217 = arith.addf %205, %214 : vector<16x16xf32>
    %218 = arith.addf %206, %216 : vector<16x16xf32>
    %219 = arith.mulf %214, %214 : vector<16x16xf32>
    %220 = arith.addf %208, %219 : vector<16x16xf32>
    %221 = arith.mulf %216, %216 : vector<16x16xf32>
    %222 = arith.addf %210, %221 : vector<16x16xf32>
    %223 = arith.mulf %214, %216 : vector<16x16xf32>
    %224 = arith.addf %212, %223 : vector<16x16xf32>
    %c0_137 = arith.constant 0 : index
    %c1_138 = arith.constant 1 : index
    %c1_139 = arith.constant 1 : index
    %c0_140 = arith.constant 0 : index
    %225 = vector.load %arg2[%c0_137, %c1_138, %c1_139, %c0_140] : memref<1x3x18x18xf32, #tpu.memory_space<vmem>>, vector<1x1x16x16xf32>
    %226 = vector.shape_cast %225 : vector<1x1x16x16xf32> to vector<16x16xf32>
    %c0_141 = arith.constant 0 : index
    %c1_142 = arith.constant 1 : index
    %c1_143 = arith.constant 1 : index
    %c0_144 = arith.constant 0 : index
    %227 = vector.load %arg1[%c0_141, %c1_142, %c1_143, %c0_144] : memref<1x3x18x18xf32, #tpu.memory_space<vmem>>, vector<1x1x16x16xf32>
    %228 = vector.shape_cast %227 : vector<1x1x16x16xf32> to vector<16x16xf32>
    %229 = arith.addf %217, %226 : vector<16x16xf32>
    %230 = arith.addf %218, %228 : vector<16x16xf32>
    %231 = arith.mulf %226, %226 : vector<16x16xf32>
    %232 = arith.addf %220, %231 : vector<16x16xf32>
    %233 = arith.mulf %228, %228 : vector<16x16xf32>
    %234 = arith.addf %222, %233 : vector<16x16xf32>
    %235 = arith.mulf %226, %228 : vector<16x16xf32>
    %236 = arith.addf %224, %235 : vector<16x16xf32>
    %c0_145 = arith.constant 0 : index
    %c1_146 = arith.constant 1 : index
    %c1_147 = arith.constant 1 : index
    %c1_148 = arith.constant 1 : index
    %237 = vector.load %arg2[%c0_145, %c1_146, %c1_147, %c1_148] : memref<1x3x18x18xf32, #tpu.memory_space<vmem>>, vector<1x1x16x16xf32>
    %238 = vector.shape_cast %237 : vector<1x1x16x16xf32> to vector<16x16xf32>
    %c0_149 = arith.constant 0 : index
    %c1_150 = arith.constant 1 : index
    %c1_151 = arith.constant 1 : index
    %c1_152 = arith.constant 1 : index
    %239 = vector.load %arg1[%c0_149, %c1_150, %c1_151, %c1_152] : memref<1x3x18x18xf32, #tpu.memory_space<vmem>>, vector<1x1x16x16xf32>
    %240 = vector.shape_cast %239 : vector<1x1x16x16xf32> to vector<16x16xf32>
    %241 = arith.addf %229, %238 : vector<16x16xf32>
    %242 = arith.addf %230, %240 : vector<16x16xf32>
    %243 = arith.mulf %238, %238 : vector<16x16xf32>
    %244 = arith.addf %232, %243 : vector<16x16xf32>
    %245 = arith.mulf %240, %240 : vector<16x16xf32>
    %246 = arith.addf %234, %245 : vector<16x16xf32>
    %247 = arith.mulf %238, %240 : vector<16x16xf32>
    %248 = arith.addf %236, %247 : vector<16x16xf32>
    %c0_153 = arith.constant 0 : index
    %c1_154 = arith.constant 1 : index
    %c1_155 = arith.constant 1 : index
    %c2_156 = arith.constant 2 : index
    %249 = vector.load %arg2[%c0_153, %c1_154, %c1_155, %c2_156] : memref<1x3x18x18xf32, #tpu.memory_space<vmem>>, vector<1x1x16x16xf32>
    %250 = vector.shape_cast %249 : vector<1x1x16x16xf32> to vector<16x16xf32>
    %c0_157 = arith.constant 0 : index
    %c1_158 = arith.constant 1 : index
    %c1_159 = arith.constant 1 : index
    %c2_160 = arith.constant 2 : index
    %251 = vector.load %arg1[%c0_157, %c1_158, %c1_159, %c2_160] : memref<1x3x18x18xf32, #tpu.memory_space<vmem>>, vector<1x1x16x16xf32>
    %252 = vector.shape_cast %251 : vector<1x1x16x16xf32> to vector<16x16xf32>
    %253 = arith.addf %241, %250 : vector<16x16xf32>
    %254 = arith.addf %242, %252 : vector<16x16xf32>
    %255 = arith.mulf %250, %250 : vector<16x16xf32>
    %256 = arith.addf %244, %255 : vector<16x16xf32>
    %257 = arith.mulf %252, %252 : vector<16x16xf32>
    %258 = arith.addf %246, %257 : vector<16x16xf32>
    %259 = arith.mulf %250, %252 : vector<16x16xf32>
    %260 = arith.addf %248, %259 : vector<16x16xf32>
    %c0_161 = arith.constant 0 : index
    %c1_162 = arith.constant 1 : index
    %c2_163 = arith.constant 2 : index
    %c0_164 = arith.constant 0 : index
    %261 = vector.load %arg2[%c0_161, %c1_162, %c2_163, %c0_164] : memref<1x3x18x18xf32, #tpu.memory_space<vmem>>, vector<1x1x16x16xf32>
    %262 = vector.shape_cast %261 : vector<1x1x16x16xf32> to vector<16x16xf32>
    %c0_165 = arith.constant 0 : index
    %c1_166 = arith.constant 1 : index
    %c2_167 = arith.constant 2 : index
    %c0_168 = arith.constant 0 : index
    %263 = vector.load %arg1[%c0_165, %c1_166, %c2_167, %c0_168] : memref<1x3x18x18xf32, #tpu.memory_space<vmem>>, vector<1x1x16x16xf32>
    %264 = vector.shape_cast %263 : vector<1x1x16x16xf32> to vector<16x16xf32>
    %265 = arith.addf %253, %262 : vector<16x16xf32>
    %266 = arith.addf %254, %264 : vector<16x16xf32>
    %267 = arith.mulf %262, %262 : vector<16x16xf32>
    %268 = arith.addf %256, %267 : vector<16x16xf32>
    %269 = arith.mulf %264, %264 : vector<16x16xf32>
    %270 = arith.addf %258, %269 : vector<16x16xf32>
    %271 = arith.mulf %262, %264 : vector<16x16xf32>
    %272 = arith.addf %260, %271 : vector<16x16xf32>
    %c0_169 = arith.constant 0 : index
    %c1_170 = arith.constant 1 : index
    %c2_171 = arith.constant 2 : index
    %c1_172 = arith.constant 1 : index
    %273 = vector.load %arg2[%c0_169, %c1_170, %c2_171, %c1_172] : memref<1x3x18x18xf32, #tpu.memory_space<vmem>>, vector<1x1x16x16xf32>
    %274 = vector.shape_cast %273 : vector<1x1x16x16xf32> to vector<16x16xf32>
    %c0_173 = arith.constant 0 : index
    %c1_174 = arith.constant 1 : index
    %c2_175 = arith.constant 2 : index
    %c1_176 = arith.constant 1 : index
    %275 = vector.load %arg1[%c0_173, %c1_174, %c2_175, %c1_176] : memref<1x3x18x18xf32, #tpu.memory_space<vmem>>, vector<1x1x16x16xf32>
    %276 = vector.shape_cast %275 : vector<1x1x16x16xf32> to vector<16x16xf32>
    %277 = arith.addf %265, %274 : vector<16x16xf32>
    %278 = arith.addf %266, %276 : vector<16x16xf32>
    %279 = arith.mulf %274, %274 : vector<16x16xf32>
    %280 = arith.addf %268, %279 : vector<16x16xf32>
    %281 = arith.mulf %276, %276 : vector<16x16xf32>
    %282 = arith.addf %270, %281 : vector<16x16xf32>
    %283 = arith.mulf %274, %276 : vector<16x16xf32>
    %284 = arith.addf %272, %283 : vector<16x16xf32>
    %c0_177 = arith.constant 0 : index
    %c1_178 = arith.constant 1 : index
    %c2_179 = arith.constant 2 : index
    %c2_180 = arith.constant 2 : index
    %285 = vector.load %arg2[%c0_177, %c1_178, %c2_179, %c2_180] : memref<1x3x18x18xf32, #tpu.memory_space<vmem>>, vector<1x1x16x16xf32>
    %286 = vector.shape_cast %285 : vector<1x1x16x16xf32> to vector<16x16xf32>
    %c0_181 = arith.constant 0 : index
    %c1_182 = arith.constant 1 : index
    %c2_183 = arith.constant 2 : index
    %c2_184 = arith.constant 2 : index
    %287 = vector.load %arg1[%c0_181, %c1_182, %c2_183, %c2_184] : memref<1x3x18x18xf32, #tpu.memory_space<vmem>>, vector<1x1x16x16xf32>
    %288 = vector.shape_cast %287 : vector<1x1x16x16xf32> to vector<16x16xf32>
    %289 = arith.addf %277, %286 : vector<16x16xf32>
    %290 = arith.addf %278, %288 : vector<16x16xf32>
    %291 = arith.mulf %286, %286 : vector<16x16xf32>
    %292 = arith.addf %280, %291 : vector<16x16xf32>
    %293 = arith.mulf %288, %288 : vector<16x16xf32>
    %294 = arith.addf %282, %293 : vector<16x16xf32>
    %295 = arith.mulf %286, %288 : vector<16x16xf32>
    %296 = arith.addf %284, %295 : vector<16x16xf32>
    %cst_185 = arith.constant 0.111111112 : f32
    %297 = vector.broadcast %cst_185 : f32 to vector<16x16xf32>
    %298 = arith.mulf %289, %297 : vector<16x16xf32>
    %cst_186 = arith.constant 0.111111112 : f32
    %299 = vector.broadcast %cst_186 : f32 to vector<16x16xf32>
    %300 = arith.mulf %290, %299 : vector<16x16xf32>
    %cst_187 = arith.constant 0.111111112 : f32
    %301 = vector.broadcast %cst_187 : f32 to vector<16x16xf32>
    %302 = arith.mulf %292, %301 : vector<16x16xf32>
    %303 = arith.mulf %298, %298 : vector<16x16xf32>
    %304 = arith.subf %302, %303 : vector<16x16xf32>
    %cst_188 = arith.constant 0.111111112 : f32
    %305 = vector.broadcast %cst_188 : f32 to vector<16x16xf32>
    %306 = arith.mulf %294, %305 : vector<16x16xf32>
    %307 = arith.mulf %300, %300 : vector<16x16xf32>
    %308 = arith.subf %306, %307 : vector<16x16xf32>
    %cst_189 = arith.constant 0.111111112 : f32
    %309 = vector.broadcast %cst_189 : f32 to vector<16x16xf32>
    %310 = arith.mulf %296, %309 : vector<16x16xf32>
    %311 = arith.mulf %298, %300 : vector<16x16xf32>
    %312 = arith.subf %310, %311 : vector<16x16xf32>
    %cst_190 = arith.constant 2.000000e+00 : f32
    %313 = vector.broadcast %cst_190 : f32 to vector<16x16xf32>
    %314 = arith.mulf %313, %298 : vector<16x16xf32>
    %315 = arith.mulf %314, %300 : vector<16x16xf32>
    %cst_191 = arith.constant 9.99999974E-5 : f32
    %316 = vector.broadcast %cst_191 : f32 to vector<16x16xf32>
    %317 = arith.addf %315, %316 : vector<16x16xf32>
    %cst_192 = arith.constant 2.000000e+00 : f32
    %318 = vector.broadcast %cst_192 : f32 to vector<16x16xf32>
    %319 = arith.mulf %318, %312 : vector<16x16xf32>
    %cst_193 = arith.constant 8.99999984E-4 : f32
    %320 = vector.broadcast %cst_193 : f32 to vector<16x16xf32>
    %321 = arith.addf %319, %320 : vector<16x16xf32>
    %322 = arith.mulf %317, %321 : vector<16x16xf32>
    %323 = arith.mulf %298, %298 : vector<16x16xf32>
    %324 = arith.mulf %300, %300 : vector<16x16xf32>
    %325 = arith.addf %323, %324 : vector<16x16xf32>
    %cst_194 = arith.constant 9.99999974E-5 : f32
    %326 = vector.broadcast %cst_194 : f32 to vector<16x16xf32>
    %327 = arith.addf %325, %326 : vector<16x16xf32>
    %328 = arith.addf %304, %308 : vector<16x16xf32>
    %cst_195 = arith.constant 8.99999984E-4 : f32
    %329 = vector.broadcast %cst_195 : f32 to vector<16x16xf32>
    %330 = arith.addf %328, %329 : vector<16x16xf32>
    %331 = arith.mulf %327, %330 : vector<16x16xf32>
    %332 = arith.divf %322, %331 : vector<16x16xf32>
    %333 = arith.mulf %332, %17 : vector<16x16xf32>
    %cst_196 = arith.constant 1.000000e+00 : f32
    %334 = vector.broadcast %cst_196 : f32 to vector<16x16xf32>
    %335 = arith.subf %334, %333 : vector<16x16xf32>
    %336 = arith.subf %238, %240 : vector<16x16xf32>
    %337 = arith.mulf %336, %17 : vector<16x16xf32>
    %338 = arith.mulf %337, %19 : vector<16x16xf32>
    %339 = arith.mulf %335, %19 : vector<16x16xf32>
    %340 = arith.mulf %338, %338 : vector<16x16xf32>
    %cst_197 = arith.constant 0.00999999977 : f32
    %341 = vector.broadcast %cst_197 : f32 to vector<16x16xf32>
    %342 = arith.addf %340, %341 : vector<16x16xf32>
    %343 = math.sqrt %342 : vector<16x16xf32>
    %344 = arith.addf %182, %343 : vector<16x16xf32>
    %345 = arith.addf %183, %339 : vector<16x16xf32>
    %cst_198 = arith.constant 0.000000e+00 : f32
    %346 = vector.broadcast %cst_198 : f32 to vector<16x16xf32>
    %cst_199 = arith.constant 0.000000e+00 : f32
    %347 = vector.broadcast %cst_199 : f32 to vector<16x16xf32>
    %cst_200 = arith.constant 0.000000e+00 : f32
    %348 = vector.broadcast %cst_200 : f32 to vector<16x16xf32>
    %cst_201 = arith.constant 0.000000e+00 : f32
    %349 = vector.broadcast %cst_201 : f32 to vector<16x16xf32>
    %cst_202 = arith.constant 0.000000e+00 : f32
    %350 = vector.broadcast %cst_202 : f32 to vector<16x16xf32>
    %c0_203 = arith.constant 0 : index
    %c2_204 = arith.constant 2 : index
    %c0_205 = arith.constant 0 : index
    %c0_206 = arith.constant 0 : index
    %351 = vector.load %arg2[%c0_203, %c2_204, %c0_205, %c0_206] : memref<1x3x18x18xf32, #tpu.memory_space<vmem>>, vector<1x1x16x16xf32>
    %352 = vector.shape_cast %351 : vector<1x1x16x16xf32> to vector<16x16xf32>
    %c0_207 = arith.constant 0 : index
    %c2_208 = arith.constant 2 : index
    %c0_209 = arith.constant 0 : index
    %c0_210 = arith.constant 0 : index
    %353 = vector.load %arg1[%c0_207, %c2_208, %c0_209, %c0_210] : memref<1x3x18x18xf32, #tpu.memory_space<vmem>>, vector<1x1x16x16xf32>
    %354 = vector.shape_cast %353 : vector<1x1x16x16xf32> to vector<16x16xf32>
    %355 = arith.addf %346, %352 : vector<16x16xf32>
    %356 = arith.addf %347, %354 : vector<16x16xf32>
    %357 = arith.mulf %352, %352 : vector<16x16xf32>
    %358 = arith.addf %348, %357 : vector<16x16xf32>
    %359 = arith.mulf %354, %354 : vector<16x16xf32>
    %360 = arith.addf %349, %359 : vector<16x16xf32>
    %361 = arith.mulf %352, %354 : vector<16x16xf32>
    %362 = arith.addf %350, %361 : vector<16x16xf32>
    %c0_211 = arith.constant 0 : index
    %c2_212 = arith.constant 2 : index
    %c0_213 = arith.constant 0 : index
    %c1_214 = arith.constant 1 : index
    %363 = vector.load %arg2[%c0_211, %c2_212, %c0_213, %c1_214] : memref<1x3x18x18xf32, #tpu.memory_space<vmem>>, vector<1x1x16x16xf32>
    %364 = vector.shape_cast %363 : vector<1x1x16x16xf32> to vector<16x16xf32>
    %c0_215 = arith.constant 0 : index
    %c2_216 = arith.constant 2 : index
    %c0_217 = arith.constant 0 : index
    %c1_218 = arith.constant 1 : index
    %365 = vector.load %arg1[%c0_215, %c2_216, %c0_217, %c1_218] : memref<1x3x18x18xf32, #tpu.memory_space<vmem>>, vector<1x1x16x16xf32>
    %366 = vector.shape_cast %365 : vector<1x1x16x16xf32> to vector<16x16xf32>
    %367 = arith.addf %355, %364 : vector<16x16xf32>
    %368 = arith.addf %356, %366 : vector<16x16xf32>
    %369 = arith.mulf %364, %364 : vector<16x16xf32>
    %370 = arith.addf %358, %369 : vector<16x16xf32>
    %371 = arith.mulf %366, %366 : vector<16x16xf32>
    %372 = arith.addf %360, %371 : vector<16x16xf32>
    %373 = arith.mulf %364, %366 : vector<16x16xf32>
    %374 = arith.addf %362, %373 : vector<16x16xf32>
    %c0_219 = arith.constant 0 : index
    %c2_220 = arith.constant 2 : index
    %c0_221 = arith.constant 0 : index
    %c2_222 = arith.constant 2 : index
    %375 = vector.load %arg2[%c0_219, %c2_220, %c0_221, %c2_222] : memref<1x3x18x18xf32, #tpu.memory_space<vmem>>, vector<1x1x16x16xf32>
    %376 = vector.shape_cast %375 : vector<1x1x16x16xf32> to vector<16x16xf32>
    %c0_223 = arith.constant 0 : index
    %c2_224 = arith.constant 2 : index
    %c0_225 = arith.constant 0 : index
    %c2_226 = arith.constant 2 : index
    %377 = vector.load %arg1[%c0_223, %c2_224, %c0_225, %c2_226] : memref<1x3x18x18xf32, #tpu.memory_space<vmem>>, vector<1x1x16x16xf32>
    %378 = vector.shape_cast %377 : vector<1x1x16x16xf32> to vector<16x16xf32>
    %379 = arith.addf %367, %376 : vector<16x16xf32>
    %380 = arith.addf %368, %378 : vector<16x16xf32>
    %381 = arith.mulf %376, %376 : vector<16x16xf32>
    %382 = arith.addf %370, %381 : vector<16x16xf32>
    %383 = arith.mulf %378, %378 : vector<16x16xf32>
    %384 = arith.addf %372, %383 : vector<16x16xf32>
    %385 = arith.mulf %376, %378 : vector<16x16xf32>
    %386 = arith.addf %374, %385 : vector<16x16xf32>
    %c0_227 = arith.constant 0 : index
    %c2_228 = arith.constant 2 : index
    %c1_229 = arith.constant 1 : index
    %c0_230 = arith.constant 0 : index
    %387 = vector.load %arg2[%c0_227, %c2_228, %c1_229, %c0_230] : memref<1x3x18x18xf32, #tpu.memory_space<vmem>>, vector<1x1x16x16xf32>
    %388 = vector.shape_cast %387 : vector<1x1x16x16xf32> to vector<16x16xf32>
    %c0_231 = arith.constant 0 : index
    %c2_232 = arith.constant 2 : index
    %c1_233 = arith.constant 1 : index
    %c0_234 = arith.constant 0 : index
    %389 = vector.load %arg1[%c0_231, %c2_232, %c1_233, %c0_234] : memref<1x3x18x18xf32, #tpu.memory_space<vmem>>, vector<1x1x16x16xf32>
    %390 = vector.shape_cast %389 : vector<1x1x16x16xf32> to vector<16x16xf32>
    %391 = arith.addf %379, %388 : vector<16x16xf32>
    %392 = arith.addf %380, %390 : vector<16x16xf32>
    %393 = arith.mulf %388, %388 : vector<16x16xf32>
    %394 = arith.addf %382, %393 : vector<16x16xf32>
    %395 = arith.mulf %390, %390 : vector<16x16xf32>
    %396 = arith.addf %384, %395 : vector<16x16xf32>
    %397 = arith.mulf %388, %390 : vector<16x16xf32>
    %398 = arith.addf %386, %397 : vector<16x16xf32>
    %c0_235 = arith.constant 0 : index
    %c2_236 = arith.constant 2 : index
    %c1_237 = arith.constant 1 : index
    %c1_238 = arith.constant 1 : index
    %399 = vector.load %arg2[%c0_235, %c2_236, %c1_237, %c1_238] : memref<1x3x18x18xf32, #tpu.memory_space<vmem>>, vector<1x1x16x16xf32>
    %400 = vector.shape_cast %399 : vector<1x1x16x16xf32> to vector<16x16xf32>
    %c0_239 = arith.constant 0 : index
    %c2_240 = arith.constant 2 : index
    %c1_241 = arith.constant 1 : index
    %c1_242 = arith.constant 1 : index
    %401 = vector.load %arg1[%c0_239, %c2_240, %c1_241, %c1_242] : memref<1x3x18x18xf32, #tpu.memory_space<vmem>>, vector<1x1x16x16xf32>
    %402 = vector.shape_cast %401 : vector<1x1x16x16xf32> to vector<16x16xf32>
    %403 = arith.addf %391, %400 : vector<16x16xf32>
    %404 = arith.addf %392, %402 : vector<16x16xf32>
    %405 = arith.mulf %400, %400 : vector<16x16xf32>
    %406 = arith.addf %394, %405 : vector<16x16xf32>
    %407 = arith.mulf %402, %402 : vector<16x16xf32>
    %408 = arith.addf %396, %407 : vector<16x16xf32>
    %409 = arith.mulf %400, %402 : vector<16x16xf32>
    %410 = arith.addf %398, %409 : vector<16x16xf32>
    %c0_243 = arith.constant 0 : index
    %c2_244 = arith.constant 2 : index
    %c1_245 = arith.constant 1 : index
    %c2_246 = arith.constant 2 : index
    %411 = vector.load %arg2[%c0_243, %c2_244, %c1_245, %c2_246] : memref<1x3x18x18xf32, #tpu.memory_space<vmem>>, vector<1x1x16x16xf32>
    %412 = vector.shape_cast %411 : vector<1x1x16x16xf32> to vector<16x16xf32>
    %c0_247 = arith.constant 0 : index
    %c2_248 = arith.constant 2 : index
    %c1_249 = arith.constant 1 : index
    %c2_250 = arith.constant 2 : index
    %413 = vector.load %arg1[%c0_247, %c2_248, %c1_249, %c2_250] : memref<1x3x18x18xf32, #tpu.memory_space<vmem>>, vector<1x1x16x16xf32>
    %414 = vector.shape_cast %413 : vector<1x1x16x16xf32> to vector<16x16xf32>
    %415 = arith.addf %403, %412 : vector<16x16xf32>
    %416 = arith.addf %404, %414 : vector<16x16xf32>
    %417 = arith.mulf %412, %412 : vector<16x16xf32>
    %418 = arith.addf %406, %417 : vector<16x16xf32>
    %419 = arith.mulf %414, %414 : vector<16x16xf32>
    %420 = arith.addf %408, %419 : vector<16x16xf32>
    %421 = arith.mulf %412, %414 : vector<16x16xf32>
    %422 = arith.addf %410, %421 : vector<16x16xf32>
    %c0_251 = arith.constant 0 : index
    %c2_252 = arith.constant 2 : index
    %c2_253 = arith.constant 2 : index
    %c0_254 = arith.constant 0 : index
    %423 = vector.load %arg2[%c0_251, %c2_252, %c2_253, %c0_254] : memref<1x3x18x18xf32, #tpu.memory_space<vmem>>, vector<1x1x16x16xf32>
    %424 = vector.shape_cast %423 : vector<1x1x16x16xf32> to vector<16x16xf32>
    %c0_255 = arith.constant 0 : index
    %c2_256 = arith.constant 2 : index
    %c2_257 = arith.constant 2 : index
    %c0_258 = arith.constant 0 : index
    %425 = vector.load %arg1[%c0_255, %c2_256, %c2_257, %c0_258] : memref<1x3x18x18xf32, #tpu.memory_space<vmem>>, vector<1x1x16x16xf32>
    %426 = vector.shape_cast %425 : vector<1x1x16x16xf32> to vector<16x16xf32>
    %427 = arith.addf %415, %424 : vector<16x16xf32>
    %428 = arith.addf %416, %426 : vector<16x16xf32>
    %429 = arith.mulf %424, %424 : vector<16x16xf32>
    %430 = arith.addf %418, %429 : vector<16x16xf32>
    %431 = arith.mulf %426, %426 : vector<16x16xf32>
    %432 = arith.addf %420, %431 : vector<16x16xf32>
    %433 = arith.mulf %424, %426 : vector<16x16xf32>
    %434 = arith.addf %422, %433 : vector<16x16xf32>
    %c0_259 = arith.constant 0 : index
    %c2_260 = arith.constant 2 : index
    %c2_261 = arith.constant 2 : index
    %c1_262 = arith.constant 1 : index
    %435 = vector.load %arg2[%c0_259, %c2_260, %c2_261, %c1_262] : memref<1x3x18x18xf32, #tpu.memory_space<vmem>>, vector<1x1x16x16xf32>
    %436 = vector.shape_cast %435 : vector<1x1x16x16xf32> to vector<16x16xf32>
    %c0_263 = arith.constant 0 : index
    %c2_264 = arith.constant 2 : index
    %c2_265 = arith.constant 2 : index
    %c1_266 = arith.constant 1 : index
    %437 = vector.load %arg1[%c0_263, %c2_264, %c2_265, %c1_266] : memref<1x3x18x18xf32, #tpu.memory_space<vmem>>, vector<1x1x16x16xf32>
    %438 = vector.shape_cast %437 : vector<1x1x16x16xf32> to vector<16x16xf32>
    %439 = arith.addf %427, %436 : vector<16x16xf32>
    %440 = arith.addf %428, %438 : vector<16x16xf32>
    %441 = arith.mulf %436, %436 : vector<16x16xf32>
    %442 = arith.addf %430, %441 : vector<16x16xf32>
    %443 = arith.mulf %438, %438 : vector<16x16xf32>
    %444 = arith.addf %432, %443 : vector<16x16xf32>
    %445 = arith.mulf %436, %438 : vector<16x16xf32>
    %446 = arith.addf %434, %445 : vector<16x16xf32>
    %c0_267 = arith.constant 0 : index
    %c2_268 = arith.constant 2 : index
    %c2_269 = arith.constant 2 : index
    %c2_270 = arith.constant 2 : index
    %447 = vector.load %arg2[%c0_267, %c2_268, %c2_269, %c2_270] : memref<1x3x18x18xf32, #tpu.memory_space<vmem>>, vector<1x1x16x16xf32>
    %448 = vector.shape_cast %447 : vector<1x1x16x16xf32> to vector<16x16xf32>
    %c0_271 = arith.constant 0 : index
    %c2_272 = arith.constant 2 : index
    %c2_273 = arith.constant 2 : index
    %c2_274 = arith.constant 2 : index
    %449 = vector.load %arg1[%c0_271, %c2_272, %c2_273, %c2_274] : memref<1x3x18x18xf32, #tpu.memory_space<vmem>>, vector<1x1x16x16xf32>
    %450 = vector.shape_cast %449 : vector<1x1x16x16xf32> to vector<16x16xf32>
    %451 = arith.addf %439, %448 : vector<16x16xf32>
    %452 = arith.addf %440, %450 : vector<16x16xf32>
    %453 = arith.mulf %448, %448 : vector<16x16xf32>
    %454 = arith.addf %442, %453 : vector<16x16xf32>
    %455 = arith.mulf %450, %450 : vector<16x16xf32>
    %456 = arith.addf %444, %455 : vector<16x16xf32>
    %457 = arith.mulf %448, %450 : vector<16x16xf32>
    %458 = arith.addf %446, %457 : vector<16x16xf32>
    %cst_275 = arith.constant 0.111111112 : f32
    %459 = vector.broadcast %cst_275 : f32 to vector<16x16xf32>
    %460 = arith.mulf %451, %459 : vector<16x16xf32>
    %cst_276 = arith.constant 0.111111112 : f32
    %461 = vector.broadcast %cst_276 : f32 to vector<16x16xf32>
    %462 = arith.mulf %452, %461 : vector<16x16xf32>
    %cst_277 = arith.constant 0.111111112 : f32
    %463 = vector.broadcast %cst_277 : f32 to vector<16x16xf32>
    %464 = arith.mulf %454, %463 : vector<16x16xf32>
    %465 = arith.mulf %460, %460 : vector<16x16xf32>
    %466 = arith.subf %464, %465 : vector<16x16xf32>
    %cst_278 = arith.constant 0.111111112 : f32
    %467 = vector.broadcast %cst_278 : f32 to vector<16x16xf32>
    %468 = arith.mulf %456, %467 : vector<16x16xf32>
    %469 = arith.mulf %462, %462 : vector<16x16xf32>
    %470 = arith.subf %468, %469 : vector<16x16xf32>
    %cst_279 = arith.constant 0.111111112 : f32
    %471 = vector.broadcast %cst_279 : f32 to vector<16x16xf32>
    %472 = arith.mulf %458, %471 : vector<16x16xf32>
    %473 = arith.mulf %460, %462 : vector<16x16xf32>
    %474 = arith.subf %472, %473 : vector<16x16xf32>
    %cst_280 = arith.constant 2.000000e+00 : f32
    %475 = vector.broadcast %cst_280 : f32 to vector<16x16xf32>
    %476 = arith.mulf %475, %460 : vector<16x16xf32>
    %477 = arith.mulf %476, %462 : vector<16x16xf32>
    %cst_281 = arith.constant 9.99999974E-5 : f32
    %478 = vector.broadcast %cst_281 : f32 to vector<16x16xf32>
    %479 = arith.addf %477, %478 : vector<16x16xf32>
    %cst_282 = arith.constant 2.000000e+00 : f32
    %480 = vector.broadcast %cst_282 : f32 to vector<16x16xf32>
    %481 = arith.mulf %480, %474 : vector<16x16xf32>
    %cst_283 = arith.constant 8.99999984E-4 : f32
    %482 = vector.broadcast %cst_283 : f32 to vector<16x16xf32>
    %483 = arith.addf %481, %482 : vector<16x16xf32>
    %484 = arith.mulf %479, %483 : vector<16x16xf32>
    %485 = arith.mulf %460, %460 : vector<16x16xf32>
    %486 = arith.mulf %462, %462 : vector<16x16xf32>
    %487 = arith.addf %485, %486 : vector<16x16xf32>
    %cst_284 = arith.constant 9.99999974E-5 : f32
    %488 = vector.broadcast %cst_284 : f32 to vector<16x16xf32>
    %489 = arith.addf %487, %488 : vector<16x16xf32>
    %490 = arith.addf %466, %470 : vector<16x16xf32>
    %cst_285 = arith.constant 8.99999984E-4 : f32
    %491 = vector.broadcast %cst_285 : f32 to vector<16x16xf32>
    %492 = arith.addf %490, %491 : vector<16x16xf32>
    %493 = arith.mulf %489, %492 : vector<16x16xf32>
    %494 = arith.divf %484, %493 : vector<16x16xf32>
    %495 = arith.mulf %494, %17 : vector<16x16xf32>
    %cst_286 = arith.constant 1.000000e+00 : f32
    %496 = vector.broadcast %cst_286 : f32 to vector<16x16xf32>
    %497 = arith.subf %496, %495 : vector<16x16xf32>
    %498 = arith.subf %400, %402 : vector<16x16xf32>
    %499 = arith.mulf %498, %17 : vector<16x16xf32>
    %500 = arith.mulf %499, %19 : vector<16x16xf32>
    %501 = arith.mulf %497, %19 : vector<16x16xf32>
    %502 = arith.mulf %500, %500 : vector<16x16xf32>
    %cst_287 = arith.constant 0.00999999977 : f32
    %503 = vector.broadcast %cst_287 : f32 to vector<16x16xf32>
    %504 = arith.addf %502, %503 : vector<16x16xf32>
    %505 = math.sqrt %504 : vector<16x16xf32>
    %506 = arith.addf %344, %505 : vector<16x16xf32>
    %507 = arith.addf %345, %501 : vector<16x16xf32>
    %508 = vector.shape_cast %506 : vector<16x16xf32> to vector<1x16x16xf32>
    %cst_288 = arith.constant dense<0.000000e+00> : vector<1xf32>
    %509 = vector.multi_reduction <add>, %508, %cst_288 [1, 2] : vector<1x16x16xf32> to vector<1xf32>
    %510 = vector.shape_cast %509 : vector<1xf32> to vector<1x1x1xf32>
    %511 = vector.extract %510[0, 0, 0] : f32 from vector<1x1x1xf32>
    %512 = vector.shape_cast %507 : vector<16x16xf32> to vector<1x16x16xf32>
    %cst_289 = arith.constant dense<0.000000e+00> : vector<1xf32>
    %513 = vector.multi_reduction <add>, %512, %cst_289 [1, 2] : vector<1x16x16xf32> to vector<1xf32>
    %514 = vector.shape_cast %513 : vector<1xf32> to vector<1x1x1xf32>
    %515 = vector.extract %514[0, 0, 0] : f32 from vector<1x1x1xf32>
    %516 = vector.broadcast %511 : f32 to vector<1x128xf32>
    %c0_290 = arith.constant 0 : index
    %c0_291 = arith.constant 0 : index
    %c0_292 = arith.constant 0 : index
    %517 = vector.load %arg4[%c0_290, %c0_291, %c0_292] : memref<1x2x128xf32, #tpu.memory_space<vmem>>, vector<1x1x128xf32>
    %518 = vector.shape_cast %517 : vector<1x1x128xf32> to vector<1x128xf32>
    %519 = vector.shape_cast %516 : vector<1x128xf32> to vector<1x1x128xf32>
    tpu.vector_store %arg4[%c0_290, %c0_291, %c0_292], %519 {strides = array<i32>} : memref<1x2x128xf32, #tpu.memory_space<vmem>>, vector<1x1x128xf32>,
    %520 = vector.broadcast %515 : f32 to vector<1x128xf32>
    %c0_293 = arith.constant 0 : index
    %c1_294 = arith.constant 1 : index
    %c0_295 = arith.constant 0 : index
    %521 = vector.load %arg4[%c0_293, %c1_294, %c0_295] : memref<1x2x128xf32, #tpu.memory_space<vmem>>, vector<1x1x128xf32>
    %522 = vector.shape_cast %521 : vector<1x1x128xf32> to vector<1x128xf32>
    %523 = vector.shape_cast %520 : vector<1x128xf32> to vector<1x1x128xf32>
    tpu.vector_store %arg4[%c0_293, %c1_294, %c0_295], %523 {strides = array<i32>} : memref<1x2x128xf32, #tpu.memory_space<vmem>>, vector<1x1x128xf32>,
    return
  }
  func.func @transform_0(%arg0: i32) -> (i32, i32, i32, i32) {
    %c0_i32 = arith.constant 0 : i32
    %c0_i32_0 = arith.constant 0 : i32
    %c0_i32_1 = arith.constant 0 : i32
    %c0_i32_2 = arith.constant 0 : i32
    return %arg0, %c0_i32, %c0_i32_0, %c0_i32_1 : i32, i32, i32, i32
  }
  func.func @transform_1(%arg0: i32) -> (i32, i32, i32, i32) {
    %c0_i32 = arith.constant 0 : i32
    %c0_i32_0 = arith.constant 0 : i32
    %c0_i32_1 = arith.constant 0 : i32
    %c0_i32_2 = arith.constant 0 : i32
    return %arg0, %c0_i32, %c0_i32_0, %c0_i32_1 : i32, i32, i32, i32
  }
  func.func @transform_2(%arg0: i32) -> (i32, i32, i32, i32) {
    %c0_i32 = arith.constant 0 : i32
    %c0_i32_0 = arith.constant 0 : i32
    %c0_i32_1 = arith.constant 0 : i32
    %c0_i32_2 = arith.constant 0 : i32
    return %arg0, %c0_i32, %c0_i32_0, %c0_i32_1 : i32, i32, i32, i32
  }
  func.func @transform_3(%arg0: i32) -> (i32, i32, i32) {
    %c0_i32 = arith.constant 0 : i32
    %c0_i32_0 = arith.constant 0 : i32
    %c0_i32_1 = arith.constant 0 : i32
    return %arg0, %c0_i32, %c0_i32_0 : i32, i32, i32
  }
}

</mosaic_0001>

<bundles_post_ra>
// kernel: tpu_custom_call.1
= control target key start
LH: loop header
LB: loop body
LE: loop exit
PB: predicated region body
PF: predicated region fallthrough
CT: control target
= control target key end

     0   :  { %8 = vsyncpa [#allocation3], 0  ;;  %s3278_s0 = inlined_call_operand.vmem [shape: f32[2,3,18,18], index: 0, kind: input, shape index: {}]   ;;  %s3279_s1 = inlined_call_operand.vmem [shape: f32[2,3,18,18], index: 1, kind: input, shape index: {}]   ;;  %s3280_s2 = inlined_call_operand.vmem [shape: f32[2,1,16,16], index: 2, kind: input, shape index: {}]   ;;  %s3281_s3 = inlined_call_operand.hbm [shape: f32[2,2,128], index: 3, kind: output, shape index: {}]  }
   0x1   :  { %10 = vsyncpa [#allocation3 + $0x1], 0  ;;  %s1936_s12 = smov 0   ;;  %s1938_s13 = smov 0  }
   0x2   :  { %s1940_s14 = smov 0   ;;  %s1942_s15 = smov 0  }
   0x3 LB: > { %s1957_s16 = sadd.s32 4294967295, %s1910_s15   ;;  %s1727_s17 = sadd.s32 4294967294, %s1910_s15   ;;  %s1910_s15 = sphi %s1942_s15, %s3386_s15   ;;  %s1906_s14 = sphi %s1940_s14, %s3385_s14   ;;  %s1902_s13 = sphi %s1938_s13, %s3384_s13   ;;  %s1898_s12 = sphi %s1936_s12, %s3383_s12  }
   0x4   : > { %s1961_s18 = sadd.s32 1, %s1910_s15   ;;  %s101_s19 = sadd.s32 1, %s1906_s14 }
   0x5   : > { %s98_s20 = ssub.s32 %s1910_s15, %s1961_s18  ;;  %p111_p0 = scmp.ne.s32.totalorder %s1906_s14, %s1902_s13 }
   0x6   : > { %p99_p1 = scmp.eq.s32.totalorder %s98_s20, 0  ;;  %p112_p2 = scmp.eq.s32.totalorder %s1957_s16, 1 }
   0x7   : > { %p117_p3 = scmp.ne.s32.totalorder %s1902_s13, %s1898_s12  ;;  %p118_p4 = scmp.eq.s32.totalorder %s1727_s17, 1 }
   0x8   : > { %s1972_s21 = scalar_select %p99_p1, %s1906_s14, %s101_s19  }
   0x9   : > { %p1974_p5 = por %p112_p2, %p111_p0  ;;  %p1978_p6 = por %p118_p4, %p117_p3 }
   0xa   : > { %p1730_p7 = scmp.ge.s32.totalorder %s1910_s15, 1  ;;  %p160_p8 = scmp.lt.s32.totalorder %s1910_s15, 3 }
   0xc   : > { %p161_p9 = pnand %p1730_p7, %p160_p8 }
   0xe   : > { %164 = sbr.rel (%p161_p9) target bundleno = 837 (0x345), region = 32 }
  0x13   : > { %p194_p10 = scmp.lt.s32.totalorder %s1957_s16, 1  ;;  %s1912_s5 = smov 127   ;;  %v1914_v52 = vmov 0.0  }
  0x14   : > { %s1913_s6 = smov 126   ;;  %s1915_s11 = smov 1  }
  0x15   : > { %s1986_s24 = scalar_select %p194_p10, %s1957_s16, 1 }
  0x16   : > { %s191_s17 = sand.u32 1, %s1902_s13   ;;  %s1868_s9 = scalar_lea.hbm %s3281_s3, 4 }
  0x17   : > { %s1767_s25 = smul.u32 72, %s1986_s24  ;;  %s1766_s7 = sshll.u32 %s1986_s24, 4 }
  0x18   : > { %s2295_s10 = scalar_lea.vmem %s3280_s2, %s1766_s7  ;;  %s1731_s19 = sshll.u32 %s191_s17, 1 }
  0x19   : > { %s1992_s28 = scalar_lea.vmem %s3279_s1, %s1767_s25  ;;  %s1997_s4 = scalar_lea.vmem %s3278_s0, %s1767_s25  ;;  %v233_v60 = vld [vmem:[%s2295_s10] sm:$0xff] }
  0x1a   : > { %v2000_v0 = vld [vmem:[%s1992_s28] sm:$0xff]  ;;  %v2016_v3 = vld [vmem:[%s1992_s28 + $0x8] sm:$0xff]  ;;  %v2263_v48 = vld [vmem:[%s1997_s4 + $0x31] sm:$0xff]  ;;  %s193_s24 = scalar_lea.vmem [#allocation2], %s1731_s19  ;;  %s1763_s25 = sshll.u32 %s1957_s16, 1 }
  0x1b   : > { %v2003_v1 = vld [vmem:[%s1997_s4] sm:$0xff]  ;;  %257 = vrot.lane.b32.xlu0 %v2000_v0, %s1912_s5  ;;  %v2011_v2 = vmul.f32 %v2000_v0, %v2000_v0  ;;  %v2019_v4 = vld [vmem:[%s1997_s4 + $0x8] sm:$0xff]  ;;  %v2023_v5 = vmul.f32 %v2016_v3, %v2016_v3  ;;  %3324 = vst [vmem:[#allocation16_spill] sm:$0xff] %v2263_v48  ;;  %vm223_vm7 = vcmp.eq.f32.partialorder %v2263_v48, 0.0  ;;  %v2329_v48 = vld [vmem:[%s1997_s4 + $0x18] sm:$0xff]  ;;  %s1641_s29 = sshll.u32 %s193_s24, 4  ;;  %s1642_s29 = int_to_ptr.vmem [resolvable:$true] %s1641_s29 }
  0x1c   : > { %267 = vrot.lane.b32.xlu1 %v2003_v1, %s1912_s5  ;;  %v2033_v6 = vmul.f32 %v2019_v4, %v2019_v4  ;;  %v2037_v7 = vmul.f32 %v2003_v1, %v2003_v1  ;;  %v2041_v8 = vmul.f32 %v2003_v1, %v2000_v0  ;;  %v2051_v9 = vmul.f32 %v2019_v4, %v2016_v3  ;;  %v2072_v10 = vld [vmem:[%s1992_s28 + $0x1] sm:$0xff]  ;;  %v2081_v11 = vld [vmem:[%s1992_s28 + $0x9] sm:$0xff]  ;;  %v2249_v46 = vld [vmem:[%s1997_s4 + $0x19] sm:$0xff] }
  0x1d   : > { %277 = vrot.lane.b32.xlu2 %v2011_v2, %s1912_s5  ;;  %3313 = vst [vmem:[#allocation5_spill] sm:$0xff] %v2081_v11  ;;  %v2084_v12 = vld [vmem:[%s1997_s4 + $0x1] sm:$0xff]  ;;  %v2087_v13 = vld [vmem:[%s1997_s4 + $0x9] sm:$0xff]  ;;  %v2097_v14 = vmul.f32 %v2072_v10, %v2072_v10  ;;  %v2101_v15 = vmul.f32 %v2081_v11, %v2081_v11  ;;  %v2254_v47 = vld [vmem:[%s1997_s4 + $0x39] sm:$0xff]  ;;  %vm216_vm3 = vcmp.eq.f32.partialorder %v2249_v46, 0.0 }
  0x1e   : > { %3314 = vst [vmem:[#allocation6_spill] sm:$0xff] %v2084_v12  ;;  %v2105_v16 = vmul.f32 %v2084_v12, %v2084_v12  ;;  %v2115_v17 = vmul.f32 %v2087_v13, %v2087_v13  ;;  %v2119_v18 = vmul.f32 %v2072_v10, %v2084_v12  ;;  %v2123_v19 = vmul.f32 %v2081_v11, %v2087_v13  ;;  %v2154_v22 = vld [vmem:[%s1992_s28 + $0x2] sm:$0xff]  ;;  %v2157_v23 = vld [vmem:[%s1992_s28 + $0xa] sm:$0xff] }
  0x1f   : > { %3315 = vst [vmem:[#allocation7_spill] sm:$0xff] %v2154_v22  ;;  %v2168_v25 = vld [vmem:[%s1997_s4 + $0xa] sm:$0xff]  ;;  %v2171_v26 = vld [vmem:[%s1997_s4 + $0x2] sm:$0xff]  ;;  %v2175_v27 = vmul.f32 %v2154_v22, %v2154_v22  ;;  %v2195_v32 = vmul.f32 %v2157_v23, %v2157_v23  ;;  %vm212_vm0 = vcmp.eq.f32.partialorder %v2087_v13, 0.0  ;;  %vm211_vm2 = vcmp.eq.f32.partialorder %v2084_v12, 0.0 }
  0x20   : > { %3316 = vst [vmem:[#allocation8_spill] sm:$0xff] %v2157_v23  ;;  %v2191_v31 = vmul.f32 %v2171_v26, %v2171_v26  ;;  %v2199_v33 = vmul.f32 %v2168_v25, %v2168_v25  ;;  %v2215_v37 = vmul.f32 %v2168_v25, %v2157_v23  ;;  %v2219_v38 = vmul.f32 %v2171_v26, %v2154_v22  ;;  %v2246_v45 = vld [vmem:[%s1997_s4 + $0x21] sm:$0xff]  ;;  %vm218_vm6 = vmand %vm211_vm2, %vm216_vm3 }
  0x21   : > { %3317 = vst [vmem:[#allocation9_spill] sm:$0xff] %v2171_v26  ;;  %vm217_vm1 = vcmp.eq.f32.partialorder %v2246_v45, 0.0  ;;  %vm224_vm5 = vcmp.eq.f32.partialorder %v2254_v47, 0.0  ;;  %vm225_vm9 = vmand %vm218_vm6, %vm223_vm7 }
  0x22   : > { %3318 = vst [vmem:[#allocation10_spill] sm:$0xff] %v2191_v31  ;;  %vm219_vm4 = vmand %vm212_vm0, %vm217_vm1  ;;  %v1740_v54 = vsel %vm225_vm9, 1.0, %v1914_v52 }
  0x23   : > { %259 = vrot.lane.b32.xlu0 %v2016_v3, %s1912_s5  ;;  %3319 = vst [vmem:[#allocation11_spill] sm:$0xff] %v2195_v32  ;;  %vm226_vm8 = vmand %vm219_vm4, %vm224_vm5  ;;  %v2290_v59 = vsub.f32 1.0, %v1740_v54  ;;  %v2313_v54 = vld [vmem:[%s1992_s28 + $0x20] sm:$0xff] }
  0x24   : > { %269 = vrot.lane.b32.xlu1 %v2019_v4, %s1912_s5  ;;  %3320 = vst [vmem:[#allocation12_spill] sm:$0xff] %v2215_v37  ;;  %v1741_v53 = vsel %vm226_vm8, 1.0, %v1914_v52  ;;  %v2309_v52 = vld [vmem:[%s1992_s28 + $0x18] sm:$0xff] }
  0x25   : > { %279 = vrot.lane.b32.xlu2 %v2023_v5, %s1912_s5  ;;  %3321 = vst [vmem:[#allocation13_spill] sm:$0xff] %v2219_v38  ;;  %v2288_v58 = vsub.f32 1.0, %v1741_v53  ;;  %v234_v53 = vld [vmem:[%s2295_s10 + $0x8] sm:$0xff] }
  0x26   : > { %3322 = vst [vmem:[#allocation14_spill] sm:$0xff] %v2246_v45 }
  0x27   : > { %3323 = vst [vmem:[#allocation15_spill] sm:$0xff] %v2254_v47 }
  0x28   : > { %3326 = vst [vmem:[#allocation18_spill] sm:$0xff] %v2288_v58 }
  0x29   : > { %3327 = vst [vmem:[#allocation19_spill] sm:$0xff] %v2290_v59 }
  0x2a   : > { %3329 = vst [vmem:[#allocation21_spill] sm:$0xff] %v2309_v52 }
  0x2b   : > { %287 = vrot.lane.b32.xlu0 %v2037_v7, %s1912_s5 }
  0x2c   : > { %289 = vrot.lane.b32.xlu1 %v2033_v6, %s1912_s5 }
  0x2d   : > { %297 = vrot.lane.b32.xlu2 %v2041_v8, %s1912_s5 }
  0x33   : > { %299 = vrot.lane.b32.xlu0 %v2051_v9, %s1912_s5 }
  0x34   : > { %305 = vrot.lane.b32.xlu1 %v2000_v0, %s1913_s6 }
  0x35   : > { %307 = vrot.lane.b32.xlu2 %v2016_v3, %s1913_s6 }
  0x3b   : > { %313 = vrot.lane.b32.xlu0 %v2003_v1, %s1913_s6 }
  0x3c   : > { %315 = vrot.lane.b32.xlu1 %v2019_v4, %s1913_s6 }
  0x3d   : > { %321 = vrot.lane.b32.xlu2 %v2011_v2, %s1913_s6 }
  0x43   : > { %323 = vrot.lane.b32.xlu0 %v2023_v5, %s1913_s6 }
  0x44   : > { %329 = vrot.lane.b32.xlu1 %v2037_v7, %s1913_s6 }
  0x45   : > { %331 = vrot.lane.b32.xlu2 %v2033_v6, %s1913_s6 }
  0x4b   : > { %337 = vrot.lane.b32.xlu0 %v2041_v8, %s1913_s6 }
  0x4c   : > { %339 = vrot.lane.b32.xlu1 %v2051_v9, %s1913_s6 }
  0x4d   : > { %365 = vrot.lane.b32.xlu2 %v2072_v10, %s1912_s5 }
  0x53   : > { %367 = vrot.lane.b32.xlu0 %v2081_v11, %s1912_s5 }
  0x54   : > { %375 = vrot.lane.b32.xlu1 %v2084_v12, %s1912_s5 }
  0x55   : > { %377 = vrot.lane.b32.xlu2 %v2087_v13, %s1912_s5 }
  0x5b   : > { %385 = vrot.lane.b32.xlu0 %v2097_v14, %s1912_s5 }
  0x5c   : > { %387 = vrot.lane.b32.xlu1 %v2101_v15, %s1912_s5 }
  0x5d   : > { %395 = vrot.lane.b32.xlu2 %v2105_v16, %s1912_s5 }
  0x63   : > { %397 = vrot.lane.b32.xlu0 %v2115_v17, %s1912_s5 }
  0x64   : > { %405 = vrot.lane.b32.xlu1 %v2119_v18, %s1912_s5 }
  0x65   : > { %407 = vrot.lane.b32.xlu2 %v2123_v19, %s1912_s5 }
  0x6b   : > { %413 = vrot.lane.b32.xlu0 %v2072_v10, %s1913_s6 }
  0x6c   : > { %415 = vrot.lane.b32.xlu1 %v2081_v11, %s1913_s6 }
  0x6d   : > { %421 = vrot.lane.b32.xlu2 %v2084_v12, %s1913_s6 }
  0x73   : > { %423 = vrot.lane.b32.xlu0 %v2087_v13, %s1913_s6 }
  0x74   : > { %429 = vrot.lane.b32.xlu1 %v2097_v14, %s1913_s6 }
  0x75   : > { %431 = vrot.lane.b32.xlu2 %v2101_v15, %s1913_s6 }
  0x77   : > { %v2143_v20 = vpop.permute.xlu2 %277 }
  0x7b   : > { %437 = vrot.lane.b32.xlu0 %v2105_v16, %s1913_s6 }
  0x7c   : > { %439 = vrot.lane.b32.xlu1 %v2115_v17, %s1913_s6 }
  0x7d   : > { %445 = vrot.lane.b32.xlu2 %v2119_v18, %s1913_s6 }
  0x7f   : > { %v2151_v21 = vpop.permute.xlu2 %279 }
  0x83   : > { %447 = vrot.lane.b32.xlu0 %v2123_v19, %s1913_s6 }
  0x84   : > { %475 = vrot.lane.b32.xlu1 %v2154_v22, %s1912_s5 }
  0x85   : > { %477 = vrot.lane.b32.xlu2 %v2157_v23, %s1912_s5 }
  0x87   : > { %v2165_v24 = vpop.permute.xlu2 %297 }
  0x8b   : > { %485 = vrot.lane.b32.xlu0 %v2171_v26, %s1912_s5 }
  0x8c   : > { %487 = vrot.lane.b32.xlu1 %v2168_v25, %s1912_s5 }
  0x8d   : > { %v2181_v28 = vpop.permute.xlu0 %257  ;;  %495 = vrot.lane.b32.xlu2 %v2175_v27, %s1912_s5 }
  0x8e   : > { %v2183_v29 = vpop.permute.xlu1 %267 }
  0x8f   : > { %v2187_v30 = vpop.permute.xlu2 %307 }
  0x93   : > { %497 = vrot.lane.b32.xlu0 %v2195_v32, %s1912_s5 }
  0x94   : > { %505 = vrot.lane.b32.xlu1 %v2191_v31, %s1912_s5 }
  0x95   : > { %v2205_v34 = vpop.permute.xlu0 %259  ;;  %507 = vrot.lane.b32.xlu2 %v2199_v33, %s1912_s5 }
  0x96   : > { %v2207_v35 = vpop.permute.xlu1 %269 }
  0x97   : > { %v2211_v36 = vpop.permute.xlu2 %321 }
  0x9b   : > { %515 = vrot.lane.b32.xlu0 %v2219_v38, %s1912_s5 }
  0x9c   : > { %517 = vrot.lane.b32.xlu1 %v2215_v37, %s1912_s5 }
  0x9d   : > { %v2227_v40 = vpop.permute.xlu0 %287  ;;  %523 = vrot.lane.b32.xlu2 %v2154_v22, %s1913_s6 }
  0x9e   : > { %v2225_v39 = vpop.permute.xlu1 %289 }
  0x9f   : > { %v2231_v41 = vpop.permute.xlu2 %331 }
  0xa3   : > { %525 = vrot.lane.b32.xlu0 %v2157_v23, %s1913_s6 }
  0xa4   : > { %531 = vrot.lane.b32.xlu1 %v2171_v26, %s1913_s6  ;;  %v2333_v26 = vmul.f32 %v2309_v52, %v2309_v52 }
  0xa5   : > { %v2239_v43 = vpop.permute.xlu0 %299  ;;  %533 = vrot.lane.b32.xlu2 %v2168_v25, %s1913_s6 }
  0xa6   : > { %v2237_v42 = vpop.permute.xlu1 %305 }
  0xa7   : > { %v2243_v44 = vpop.permute.xlu2 %365 }
  0xab   : > { %539 = vrot.lane.b32.xlu0 %v2175_v27, %s1913_s6 }
  0xac   : > { %541 = vrot.lane.b32.xlu1 %v2195_v32, %s1913_s6  ;;  %v283_v32 = vadd.f32 %v2143_v20, %v2011_v2  ;;  %v294_v2 = vadd.f32 %v2225_v39, %v2033_v6  ;;  %v274_v39 = vadd.f32 %v2207_v35, %v2019_v4  ;;  %v284_v4 = vadd.f32 %v2151_v21, %v2023_v5  ;;  %v2438_v5 = vld [vmem:[%s1992_s28 + $0x19] sm:$0xff] }
  0xad   : > { %v2267_v50 = vpop.permute.xlu0 %313  ;;  %547 = vrot.lane.b32.xlu2 %v2191_v31, %s1913_s6  ;;  %v293_v35 = vadd.f32 %v2227_v40, %v2037_v7  ;;  %v263_v7 = vadd.f32 %v2181_v28, %v2000_v0 }
  0xae   : > { %v2265_v49 = vpop.permute.xlu1 %315  ;;  %3325 = vst [vmem:[#allocation17_spill] sm:$0xff] %v2267_v50 }
  0xaf   : > { %v2273_v51 = vpop.permute.xlu2 %377 }
  0xb3   : > { %549 = vrot.lane.b32.xlu0 %v2199_v33, %s1913_s6 }
  0xb4   : > { %555 = vrot.lane.b32.xlu1 %v2219_v38, %s1913_s6  ;;  %v2347_v38 = vmul.f32 %v2329_v48, %v2329_v48 }
  0xb5   : > { %v2282_v56 = vpop.permute.xlu0 %323  ;;  %557 = vrot.lane.b32.xlu2 %v2215_v37, %s1913_s6  ;;  %v2351_v37 = vmul.f32 %v2313_v54, %v2313_v54 }
  0xb6   : > { %v2280_v55 = vpop.permute.xlu1 %329 }
  0xb7   : > { %v2286_v57 = vpop.permute.xlu2 %395 }
  0xbb   : > { %639 = vrot.lane.b32.xlu0 %v2290_v59, %s1912_s5 }
  0xbc   : > { %641 = vrot.lane.b32.xlu1 %v2288_v58, %s1912_s5 }
  0xbd   : > { %v2304_v62 = vpop.permute.xlu0 %337  ;;  %655 = vrot.lane.b32.xlu2 %v233_v60, %s1915_s11  ;;  %v2326_v60 = vld [vmem:[%s1997_s4 + $0x20] sm:$0xff] }
  0xbe   : > { %v2302_v61 = vpop.permute.xlu1 %339  ;;  %v2369_v11 = vmul.f32 %v2326_v60, %v2313_v54 }
  0xbf   : > { %v2306_v63 = vpop.permute.xlu2 %407 }
  0xc0   : > { %3328 = vst [vmem:[#allocation20_spill] sm:$0xff] %v2306_v63  ;;  %v2373_v63 = vmul.f32 %v2329_v48, %v2309_v52 }
  0xc3   : > { %657 = vrot.lane.b32.xlu0 %v234_v53, %s1915_s11 }
  0xc4   : > { %720 = vrot.lane.b32.xlu1 %v2309_v52, %s1912_s5 }
  0xc5   : > { %v2317_v58 = vpop.permute.xlu0 %367  ;;  %722 = vrot.lane.b32.xlu2 %v2313_v54, %s1912_s5 }
  0xc6   : > { %3330 = vst [vmem:[#allocation22_spill] sm:$0xff] %v2317_v58  ;;  %v2319_v59 = vpop.permute.xlu1 %375 }
  0xc7   : > { %3331 = vst [vmem:[#allocation23_spill] sm:$0xff] %v2319_v59  ;;  %v2323_v47 = vpop.permute.xlu2 %421  ;;  %v2355_v59 = vmul.f32 %v2326_v60, %v2326_v60 }
  0xc8   : > { %3332 = vst [vmem:[#allocation24_spill] sm:$0xff] %v2323_v47 }
  0xcb   : > { %730 = vrot.lane.b32.xlu0 %v2329_v48, %s1912_s5 }
  0xcc   : > { %732 = vrot.lane.b32.xlu1 %v2326_v60, %s1912_s5 }
  0xcd   : > { %v386_v53 = vpop.permute.xlu0 %385  ;;  %740 = vrot.lane.b32.xlu2 %v2333_v26, %s1912_s5 }
  0xce   : > { %v2339_v23 = vpop.permute.xlu1 %387 }
  0xcf   : > { %v2343_v47 = vpop.permute.xlu2 %431 }
  0xd3   : > { %742 = vrot.lane.b32.xlu0 %v2351_v37, %s1912_s5 }
  0xd4   : > { %750 = vrot.lane.b32.xlu1 %v2347_v38, %s1912_s5 }
  0xd5   : > { %v398_v58 = vpop.permute.xlu0 %397  ;;  %752 = vrot.lane.b32.xlu2 %v2355_v59, %s1912_s5 }
  0xd6   : > { %v2361_v22 = vpop.permute.xlu1 %405 }
  0xd7   : > { %3333 = vst [vmem:[#allocation25_spill] sm:$0xff] %v2361_v22  ;;  %v2365_v12 = vpop.permute.xlu2 %445  ;;  %v327_v22 = vadd.f32 %v2211_v36, %v283_v32  ;;  %v336_v32 = vadd.f32 %v2231_v41, %v294_v2 }
  0xd8   : > { %3334 = vst [vmem:[#allocation26_spill] sm:$0xff] %v2365_v12 }
  0xd9   : > { %v353_v20 = vadd.f32 %v2097_v14, %v327_v22  ;;  %v358_v14 = vadd.f32 %v2115_v17, %v336_v32  ;;  %v328_v32 = vadd.f32 %v2282_v56, %v284_v4 }
  0xdb   : > { %760 = vrot.lane.b32.xlu0 %v2373_v63, %s1912_s5  ;;  %v354_v40 = vadd.f32 %v2101_v15, %v328_v32  ;;  %v3344_v32 = vld [vmem:[#allocation5_spill] sm:$0xff] }
  0xdc   : > { %762 = vrot.lane.b32.xlu1 %v2369_v11, %s1912_s5 }
  0xdd   : > { %v2381_v31 = vpop.permute.xlu0 %413  ;;  %768 = vrot.lane.b32.xlu2 %v2309_v52, %s1913_s6  ;;  %v392_v0 = vadd.f32 %v2339_v23, %v354_v40  ;;  %v2501_v40 = vmul.f32 %v2249_v46, %v2249_v46 }
  0xde   : > { %3335 = vst [vmem:[#allocation27_spill] sm:$0xff] %v2381_v31  ;;  %v2383_v12 = vpop.permute.xlu1 %415  ;;  %v391_v31 = vadd.f32 %v386_v53, %v353_v20  ;;  %v402_v53 = vadd.f32 %v398_v58, %v358_v14  ;;  %v335_v58 = vadd.f32 %v2280_v55, %v293_v35  ;;  %v2435_v14 = vld [vmem:[%s1992_s28 + $0x21] sm:$0xff]  ;;  %v304_v55 = vadd.f32 %v2239_v43, %v2051_v9 }
  0xdf   : > { %3336 = vst [vmem:[#allocation28_spill] sm:$0xff] %v2383_v12  ;;  %v2388_v50 = vpop.permute.xlu2 %477  ;;  %v264_v9 = vadd.f32 %v2205_v34, %v2016_v3  ;;  %v436_v43 = vadd.f32 %v2343_v47, %v392_v0  ;;  %v3337_v47 = vld [vmem:[#allocation14_spill] sm:$0xff] }
  0xe0   : > { %v357_v21 = vadd.f32 %v2105_v16, %v335_v58  ;;  %v344_v56 = vadd.f32 %v2302_v61, %v304_v55  ;;  %v273_v61 = vadd.f32 %v2183_v29, %v2003_v1  ;;  %v3341_v29 = vld [vmem:[#allocation11_spill] sm:$0xff]  ;;  %v3346_v55 = vld [vmem:[#allocation26_spill] sm:$0xff] }
  0xe1   : > { %v312_v34 = vadd.f32 %v2187_v30, %v264_v9 }
  0xe2   : > { %v362_v3 = vadd.f32 %v2123_v19, %v344_v56  ;;  %v464_v19 = vadd.f32 %v3341_v29, %v436_v43  ;;  %v2526_v29 = vmul.f32 %v2435_v14, %v3337_v47 }
  0xe3   : > { %770 = vrot.lane.b32.xlu0 %v2313_v54, %s1913_s6 }
  0xe4   : > { %776 = vrot.lane.b32.xlu1 %v2329_v48, %s1913_s6 }
  0xe5   : > { %v424_v12 = vpop.permute.xlu0 %423  ;;  %778 = vrot.lane.b32.xlu2 %v2326_v60, %s1913_s6 }
  0xe6   : > { %v430_v45 = vpop.permute.xlu1 %429 }
  0xe7   : > { %v435_v36 = vadd.f32 %v430_v45, %v391_v31  ;;  %v496_v52 = vpop.permute.xlu2 %495 }
  0xe9   : > { %v463_v6 = vadd.f32 %v2175_v27, %v435_v36  ;;  %v320_v27 = vadd.f32 %v2265_v49, %v274_v39 }
  0xeb   : > { %v2402_v22 = vadd.f32 %v496_v52, %v463_v6  ;;  %784 = vrot.lane.b32.xlu0 %v2333_v26, %s1913_s6  ;;  %v350_v52 = vadd.f32 %v320_v27, %v2087_v13 }
  0xec   : > { %786 = vrot.lane.b32.xlu1 %v2351_v37, %s1913_s6 }
  0xed   : > { %v438_v41 = vpop.permute.xlu0 %437  ;;  %792 = vrot.lane.b32.xlu2 %v2347_v38, %s1913_s6  ;;  %v382_v13 = vadd.f32 %v2273_v51, %v350_v52  ;;  %v311_v51 = vadd.f32 %v2237_v42, %v263_v7  ;;  %v401_v42 = vadd.f32 %v2286_v57, %v357_v21  ;;  %v2472_v57 = vmul.f32 %v2435_v14, %v2435_v14  ;;  %v3342_v52 = vld [vmem:[#allocation27_spill] sm:$0xff] }
  0xee   : > { %v440_v20 = vpop.permute.xlu1 %439  ;;  %v2497_v21 = vmul.f32 %v3337_v47, %v3337_v47 }
  0xef   : > { %v444_v17 = vadd.f32 %v440_v20, %v402_v53  ;;  %v508_v31 = vpop.permute.xlu2 %507  ;;  %v428_v6 = vadd.f32 %v424_v12, %v382_v13  ;;  %v303_v12 = vadd.f32 %v2165_v24, %v2041_v8  ;;  %v347_v23 = vadd.f32 %v2072_v10, %v311_v51  ;;  %v3345_v51 = vld [vmem:[#allocation6_spill] sm:$0xff] }
  0xf0   : > { %v443_v53 = vadd.f32 %v438_v41, %v401_v42  ;;  %v3338_v41 = vld [vmem:[#allocation17_spill] sm:$0xff]  ;;  %v3347_v42 = vld [vmem:[#allocation7_spill] sm:$0xff] }
  0xf1   : > { %v468_v45 = vadd.f32 %v2199_v33, %v444_v17  ;;  %v460_v16 = vadd.f32 %v2168_v25, %v428_v6  ;;  %v343_v39 = vadd.f32 %v2304_v62, %v303_v12  ;;  %v2467_v25 = vmul.f32 %v2438_v5, %v2438_v5  ;;  %v3339_v17 = vld [vmem:[#allocation25_spill] sm:$0xff] }
  0xf2   : > { %v371_v62 = vadd.f32 %v2243_v44, %v347_v23  ;;  %v319_v27 = vadd.f32 %v3338_v41, %v273_v61  ;;  %v3343_v44 = vld [vmem:[#allocation20_spill] sm:$0xff]  ;;  %v348_v6 = vadd.f32 %v3344_v32, %v312_v34  ;;  %v3349_v23 = vld [vmem:[#allocation23_spill] sm:$0xff] }
  0xf3   : > { %v2415_v2 = vadd.f32 %v508_v31, %v468_v45  ;;  %794 = vrot.lane.b32.xlu0 %v2355_v59, %s1913_s6  ;;  %v361_v10 = vadd.f32 %v2119_v18, %v343_v39  ;;  %v3340_v45 = vld [vmem:[#allocation10_spill] sm:$0xff]  ;;  %v412_v35 = vadd.f32 %v3343_v44, %v362_v3  ;;  %v2508_v39 = vmul.f32 %v2438_v5, %v2249_v46  ;;  %v3351_v61 = vld [vmem:[#allocation12_spill] sm:$0xff] }
  0xf4   : > { %800 = vrot.lane.b32.xlu1 %v2373_v63, %s1913_s6  ;;  %v467_v1 = vadd.f32 %v3340_v45, %v443_v53  ;;  %v419_v18 = vadd.f32 %v3342_v52, %v371_v62  ;;  %v349_v12 = vadd.f32 %v319_v27, %v3345_v51  ;;  %v3353_v27 = vld [vmem:[#allocation24_spill] sm:$0xff] }
  0xf5   : > { %v448_v33 = vpop.permute.xlu0 %447  ;;  %802 = vrot.lane.b32.xlu2 %v2369_v11, %s1913_s6  ;;  %v411_v31 = vadd.f32 %v3339_v17, %v361_v10  ;;  %v3352_v10 = vld [vmem:[#allocation13_spill] sm:$0xff] }
  0xf6   : > { %v2425_v49 = vpop.permute.xlu1 %475  ;;  %v457_v56 = vadd.f32 %v3347_v42, %v419_v18 }
  0xf7   : > { %v2432_v36 = vpop.permute.xlu2 %523  ;;  %v451_v0 = vadd.f32 %v3346_v55, %v411_v31 }
  0xf8   : > { %v481_v43 = vadd.f32 %v2425_v49, %v457_v56 }
  0xf9   : > { %v471_v34 = vadd.f32 %v3352_v10, %v451_v0 }
  0xfa   : > { %v529_v45 = vadd.f32 %v2432_v36, %v481_v43 }
  0xfb   : > { %828 = vrot.lane.b32.xlu0 %v2438_v5, %s1912_s5 }
  0xfc   : > { %830 = vrot.lane.b32.xlu1 %v2435_v14, %s1912_s5  ;;  %v563_v44 = vmul.f32 0.11111111, %v529_v45 }
  0xfd   : > { %v2455_v15 = vpop.permute.xlu0 %485  ;;  %838 = vrot.lane.b32.xlu2 %v2249_v46, %s1912_s5 }
  0xfe   : > { %v488_v28 = vpop.permute.xlu1 %487  ;;  %v585_v51 = vmul.f32 2.0, %v563_v44 }
  0xff   : > { %v492_v8 = vadd.f32 %v488_v28, %v460_v16  ;;  %v534_v24 = vpop.permute.xlu2 %533  ;;  %v452_v16 = vadd.f32 %v448_v33, %v412_v35  ;;  %v3350_v33 = vld [vmem:[#allocation28_spill] sm:$0xff] }
 0x101   : > { %v538_v20 = vadd.f32 %v534_v24, %v492_v8  ;;  %v3348_v8 = vld [vmem:[#allocation22_spill] sm:$0xff]  ;;  %v381_v24 = vadd.f32 %v3349_v23, %v349_v12  ;;  %v472_v3 = vadd.f32 %v3351_v61, %v452_v16 }
 0x102   : > { %v372_v9 = vadd.f32 %v3348_v8, %v348_v6 }
 0x103   : > { %840 = vrot.lane.b32.xlu0 %v3337_v47, %s1912_s5  ;;  %v427_v17 = vadd.f32 %v3353_v27, %v381_v24  ;;  %v566_v55 = vmul.f32 0.11111111, %v538_v20  ;;  %v569_v20 = vmul.f32 %v563_v44, %v563_v44 }
 0x104   : > { %848 = vrot.lane.b32.xlu1 %v2467_v25, %s1912_s5  ;;  %v420_v53 = vadd.f32 %v3350_v33, %v372_v9 }
 0x105   : > { %v498_v30 = vpop.permute.xlu0 %497  ;;  %850 = vrot.lane.b32.xlu2 %v2472_v57, %s1912_s5 }
 0x106   : > { %v506_v4 = vpop.permute.xlu1 %505  ;;  %v2492_v58 = vadd.f32 %v498_v30, %v464_v19  ;;  %v3354_v19 = vld [vmem:[#allocation8_spill] sm:$0xff] }
 0x107   : > { %v511_v13 = vadd.f32 %v506_v4, %v467_v1  ;;  %v548_v7 = vpop.permute.xlu2 %547  ;;  %v458_v52 = vadd.f32 %v3354_v19, %v420_v53  ;;  %v3355_v4 = vld [vmem:[#allocation9_spill] sm:$0xff] }
 0x108   : > { %v459_v30 = vadd.f32 %v3355_v4, %v427_v17 }
 0x109   : > { %v553_v28 = vadd.f32 %v548_v7, %v511_v13  ;;  %v482_v35 = vadd.f32 %v2388_v50, %v458_v52 }
 0x10a   : > { %v491_v36 = vadd.f32 %v2455_v15, %v459_v30 }
 0x10b   : > { %858 = vrot.lane.b32.xlu0 %v2501_v40, %s1912_s5  ;;  %v573_v23 = vmul.f32 0.11111111, %v553_v28 }
 0x10c   : > { %860 = vrot.lane.b32.xlu1 %v2497_v21, %s1912_s5 }
 0x10d   : > { %v516_v41 = vpop.permute.xlu0 %515  ;;  %868 = vrot.lane.b32.xlu2 %v2508_v39, %s1912_s5 }
 0x10e   : > { %v518_v62 = vpop.permute.xlu1 %517  ;;  %v521_v31 = vadd.f32 %v516_v41, %v471_v34 }
 0x10f   : > { %v522_v49 = vadd.f32 %v518_v62, %v472_v3  ;;  %v558_v1 = vpop.permute.xlu2 %557  ;;  %v576_v3 = vmul.f32 %v566_v55, %v566_v55 }
 0x111   : > { %v562_v18 = vadd.f32 %v558_v1, %v522_v49 }
 0x113   : > { %870 = vrot.lane.b32.xlu0 %v2526_v29, %s1912_s5  ;;  %v580_v42 = vmul.f32 0.11111111, %v562_v18 }
 0x114   : > { %876 = vrot.lane.b32.xlu1 %v2438_v5, %s1913_s6 }
 0x115   : > { %v526_v32 = vpop.permute.xlu0 %525  ;;  %878 = vrot.lane.b32.xlu2 %v2435_v14, %s1913_s6 }
 0x116   : > { %v532_v13 = vpop.permute.xlu1 %531  ;;  %v530_v7 = vadd.f32 %v526_v32, %v482_v35 }
 0x117   : > { %v537_v6 = vadd.f32 %v532_v13, %v491_v36  ;;  %v2538_v12 = vpop.permute.xlu2 %655 }
 0x118   : > { %v564_v16 = vmul.f32 0.11111111, %v530_v7 }
 0x119   : > { %v565_v0 = vmul.f32 0.11111111, %v537_v6 }
 0x11a   : > { %v582_v9 = vmul.f32 %v566_v55, %v564_v16  ;;  %v586_v50 = vmul.f32 2.0, %v564_v16  ;;  %v570_v43 = vmul.f32 %v564_v16, %v564_v16  ;;  %v2562_v16 = vld [vmem:[%s1992_s28 + $0x1a] sm:$0xff] }
 0x11b   : > { %v575_v56 = vmul.f32 %v565_v0, %v565_v0  ;;  %v587_v8 = vmul.f32 %v585_v51, %v565_v0  ;;  %884 = vrot.lane.b32.xlu0 %v2249_v46, %s1913_s6  ;;  %v581_v17 = vmul.f32 %v565_v0, %v563_v44 }
 0x11c   : > { %886 = vrot.lane.b32.xlu1 %v3337_v47, %s1913_s6  ;;  %v584_v15 = vsub.f32 %v580_v42, %v582_v9  ;;  %v588_v24 = vmul.f32 %v586_v50, %v566_v55  ;;  %v598_v49 = vadd.f32 %v576_v3, %v570_v43 }
 0x11d   : > { %v540_v53 = vpop.permute.xlu0 %539  ;;  %v577_v61 = vsub.f32 %v573_v23, %v575_v56  ;;  %892 = vrot.lane.b32.xlu2 %v2467_v25, %s1913_s6  ;;  %v597_v41 = vadd.f32 %v575_v56, %v569_v20  ;;  %v589_v42 = vadd.f32 0.0001, %v587_v8 }
 0x11e   : > { %v542_v33 = vpop.permute.xlu1 %541  ;;  %v592_v10 = vmul.f32 2.0, %v584_v15  ;;  %v545_v34 = vadd.f32 %v540_v53, %v2402_v22  ;;  %v590_v62 = vadd.f32 0.0001, %v588_v24  ;;  %v600_v23 = vadd.f32 0.0001, %v598_v49  ;;  %v3356_v49 = vld [vmem:[#allocation21_spill] sm:$0xff] }
 0x11f   : > { %v546_v28 = vadd.f32 %v542_v33, %v2492_v58  ;;  %v2548_v27 = vpop.permute.xlu2 %722  ;;  %v599_v44 = vadd.f32 0.0001, %v597_v41 }
 0x120   : > { %v594_v45 = vadd.f32 0.0009, %v592_v10  ;;  %v567_v19 = vmul.f32 0.11111111, %v545_v34 }
 0x121   : > { %v568_v1 = vmul.f32 0.11111111, %v546_v28 }
 0x122   : > { %v571_v18 = vsub.f32 %v567_v19, %v569_v20  ;;  %v2550_v4 = vmul.f32 %v594_v45, %v590_v62  ;;  %v2577_v20 = vld [vmem:[%s1997_s4 + $0x1a] sm:$0xff] }
 0x123   : > { %v572_v52 = vsub.f32 %v568_v1, %v570_v43  ;;  %894 = vrot.lane.b32.xlu0 %v2472_v57, %s1913_s6 }
 0x124   : > { %900 = vrot.lane.b32.xlu1 %v2501_v40, %s1913_s6  ;;  %v601_v22 = vadd.f32 %v577_v61, %v571_v18  ;;  %v2580_v61 = vld [vmem:[%s1992_s28 + $0x22] sm:$0xff]  ;;  %v2600_v18 = vmul.f32 %v2562_v16, %v2562_v16 }
 0x125   : > { %v550_v30 = vpop.permute.xlu0 %549  ;;  %902 = vrot.lane.b32.xlu2 %v2497_v21, %s1913_s6 }
 0x126   : > { %v556_v58 = vpop.permute.xlu1 %555  ;;  %v603_v35 = vadd.f32 0.0009, %v601_v22  ;;  %v554_v13 = vadd.f32 %v550_v30, %v2415_v2 }
 0x127   : > { %v561_v36 = vadd.f32 %v556_v58, %v521_v31  ;;  %v2559_v32 = vpop.permute.xlu2 %740 }
 0x128   : > { %v605_v6 = vmul.f32 %v603_v35, %v599_v44  ;;  %v574_v51 = vmul.f32 0.11111111, %v554_v13 }
 0x129   : > { %v579_v7 = vmul.f32 0.11111111, %v561_v36  ;;  %v2606_v36 = vmul.f32 %v2577_v20, %v2577_v20 }
 0x12a   : > { %1815 = vrcp.f32 %v605_v6  ;;  %v578_v0 = vsub.f32 %v574_v51, %v576_v3  ;;  %v2583_v3 = vld [vmem:[%s1997_s4 + $0x22] sm:$0xff]  ;;  %v618_v28 = vand.u32 2147483648, %v605_v6  ;;  %v616_v62 = vand.u32 2147483647, %v605_v6 }
 0x12b   : > { %v583_v55 = vsub.f32 %v579_v7, %v581_v17  ;;  %908 = vrot.lane.b32.xlu0 %v2508_v39, %s1913_s6  ;;  %vm612_vm11 = vweird.f32 %v605_v6 }
 0x12c   : > { %910 = vrot.lane.b32.xlu1 %v2526_v29, %s1913_s6  ;;  %v602_v2 = vadd.f32 %v578_v0, %v572_v52  ;;  %v2596_v52 = vmul.f32 %v2580_v61, %v2580_v61  ;;  %v619_v58 = vor.u32 1.1754944e-38, %v618_v28  ;;  %vm617_vm13 = vcmp.eq.f32.partialorder %v616_v62, 8.507059e+37 }
 0x12d   : > { %v591_v31 = vmul.f32 2.0, %v583_v55  ;;  %938 = vrot.lane.b32.xlu2 %v2562_v16, %s1912_s5  ;;  %v2572_v9 = vpop.permute.xlu0 %639 }
 0x12e   : > { %v2568_v56 = vpop.permute.xlu1 %641  ;;  %v604_v15 = vadd.f32 0.0009, %v602_v2 }
 0x12f   : > { %v593_v50 = vadd.f32 0.0009, %v591_v31  ;;  %v2574_v24 = vpop.permute.xlu2 %752 }
 0x130   : > { %v1816_v43 = vpop.eup %1815  ;;  %v606_v53 = vmul.f32 %v604_v15, %v600_v23  ;;  %v2619_v15 = vmul.f32 %v2577_v20, %v2562_v16 }
 0x131   : > { %v595_v33 = vmul.f32 %v593_v50, %v589_v42  ;;  %v608_v8 = vmul.f32 %v1816_v43, %v605_v6  ;;  %vm613_vm10 = vweird.f32 %v1816_v43 }
 0x132   : > { %1817 = vrcp.f32 %v606_v53  ;;  %vm614_vm12 = vmor %vm612_vm11, %vm613_vm10  ;;  %v633_v51 = vand.u32 2147483648, %v606_v53  ;;  %v631_v0 = vand.u32 2147483647, %v606_v53  ;;  %vm627_vm15 = vweird.f32 %v606_v53 }
 0x133   : > { %v609_v10 = vsub.f32 1.0, %v608_v8  ;;  %940 = vrot.lane.b32.xlu0 %v2580_v61, %s1912_s5 }
 0x134   : > { %948 = vrot.lane.b32.xlu1 %v2577_v20, %s1912_s5  ;;  %vm632_vm1 = vcmp.eq.f32.partialorder %v631_v0, 8.507059e+37 }
 0x135   : > { %v610_v34 = vmul.f32 %v1816_v43, %v609_v10  ;;  %950 = vrot.lane.b32.xlu2 %v2583_v3, %s1912_s5  ;;  %v2591_v17 = vpop.permute.xlu0 %657 }
 0x136   : > { %v721_v41 = vpop.permute.xlu1 %720 }
 0x137   : > { %v726_v45 = vadd.f32 %v3356_v49, %v721_v41  ;;  %v611_v1 = vadd.f32 %v1816_v43, %v610_v34  ;;  %v769_v19 = vpop.permute.xlu2 %768 }
 0x138   : > { %v1818_v22 = vpop.eup %1817 }
 0x139   : > { %v2602_v30 = vadd.f32 %v769_v19, %v726_v45  ;;  %v623_v44 = vmul.f32 %v1818_v22, %v606_v53  ;;  %v615_v35 = vsel %vm614_vm12, %v1816_v43, %v611_v1  ;;  %vm628_vm14 = vweird.f32 %v1818_v22 }
 0x13a   : > { %v620_v13 = vsel %vm617_vm13, %v619_v58, %v615_v35  ;;  %v2623_v43 = vmul.f32 %v2583_v3, %v2583_v3  ;;  %vm629_vm0 = vmor %vm627_vm15, %vm628_vm14 }
 0x13b   : > { %v624_v6 = vsub.f32 1.0, %v623_v44  ;;  %v2608_v7 = vmul.f32 %v620_v13, %v595_v33  ;;  %958 = vrot.lane.b32.xlu0 %v2600_v18, %s1912_s5  ;;  %v634_v33 = vor.u32 1.1754944e-38, %v633_v51 }
 0x13c   : > { %960 = vrot.lane.b32.xlu1 %v2596_v52, %s1912_s5 }
 0x13d   : > { %v625_v55 = vmul.f32 %v1818_v22, %v624_v6  ;;  %968 = vrot.lane.b32.xlu2 %v2606_v36, %s1912_s5  ;;  %v731_v2 = vpop.permute.xlu0 %730 }
 0x13e   : > { %v733_v31 = vpop.permute.xlu1 %732  ;;  %v736_v35 = vadd.f32 %v2329_v48, %v731_v2  ;;  %v746_v48 = vadd.f32 %v2559_v32, %v2333_v26  ;;  %v757_v26 = vadd.f32 %v2574_v24, %v2355_v59 }
 0x13f   : > { %v737_v42 = vadd.f32 %v2326_v60, %v733_v31  ;;  %v626_v50 = vadd.f32 %v1818_v22, %v625_v55  ;;  %v779_v23 = vpop.permute.xlu2 %778  ;;  %v2629_v60 = vmul.f32 %v2583_v3, %v2580_v61 }
 0x141   : > { %v2625_v8 = vadd.f32 %v779_v23, %v737_v42  ;;  %v630_v10 = vsel %vm629_vm0, %v1818_v22, %v626_v50 }
 0x142   : > { %v635_v53 = vsel %vm632_vm1, %v634_v33, %v630_v10  ;;  %v2677_v33 = vld [vmem:[%s1992_s28 + $0x30] sm:$0xff] }
 0x143   : > { %v2632_v28 = vmul.f32 %v635_v53, %v2550_v4  ;;  %970 = vrot.lane.b32.xlu0 %v2623_v43, %s1912_s5  ;;  %v2682_v53 = vld [vmem:[%s1992_s28 + $0x38] sm:$0xff] }
 0x144   : > { %978 = vrot.lane.b32.xlu1 %v2619_v15, %s1912_s5 }
 0x145   : > { %980 = vrot.lane.b32.xlu2 %v2629_v60, %s1912_s5  ;;  %v743_v62 = vpop.permute.xlu0 %742 }
 0x146   : > { %v751_v34 = vpop.permute.xlu1 %750 }
 0x147   : > { %v756_v41 = vadd.f32 %v751_v34, %v2347_v38  ;;  %v793_v49 = vpop.permute.xlu2 %792 }
 0x149   : > { %v798_v45 = vadd.f32 %v793_v49, %v756_v41 }
 0x14b   : > { %v2642_v1 = vadd.f32 %v2501_v40, %v798_v45  ;;  %986 = vrot.lane.b32.xlu0 %v2562_v16, %s1913_s6  ;;  %v727_v40 = vadd.f32 %v2313_v54, %v2548_v27  ;;  %v747_v54 = vadd.f32 %v743_v62, %v2351_v37  ;;  %v2695_v45 = vld [vmem:[%s1997_s4 + $0x38] sm:$0xff] }
 0x14c   : > { %988 = vrot.lane.b32.xlu1 %v2580_v61, %s1913_s6 }
 0x14d   : > { %994 = vrot.lane.b32.xlu2 %v2577_v20, %s1913_s6  ;;  %v761_v19 = vpop.permute.xlu0 %760 }
 0x14e   : > { %v763_v4 = vpop.permute.xlu1 %762  ;;  %v766_v37 = vadd.f32 %v761_v19, %v2373_v63 }
 0x14f   : > { %v767_v22 = vadd.f32 %v763_v4, %v2369_v11  ;;  %v803_v58 = vpop.permute.xlu2 %802  ;;  %v2698_v4 = vld [vmem:[%s1997_s4 + $0x30] sm:$0xff] }
 0x151   : > { %v807_v38 = vadd.f32 %v803_v58, %v767_v22  ;;  %v2702_v22 = vmul.f32 %v2677_v33, %v2677_v33 }
 0x153   : > { %v2652_v44 = vadd.f32 %v2526_v29, %v807_v38  ;;  %996 = vrot.lane.b32.xlu0 %v2583_v3, %s1913_s6 }
 0x154   : > { %1002 = vrot.lane.b32.xlu1 %v2600_v18, %s1913_s6 }
 0x155   : > { %1004 = vrot.lane.b32.xlu2 %v2596_v52, %s1913_s6  ;;  %v771_v11 = vpop.permute.xlu0 %770 }
 0x156   : > { %v777_v13 = vpop.permute.xlu1 %776  ;;  %v775_v29 = vadd.f32 %v771_v11, %v727_v40 }
 0x157   : > { %v782_v6 = vadd.f32 %v777_v13, %v736_v35  ;;  %v839_v51 = vpop.permute.xlu2 %838  ;;  %v2717_v35 = vmul.f32 %v2698_v4, %v2698_v4  ;;  %v2721_v13 = vmul.f32 %v2682_v53, %v2682_v53 }
 0x158   : > { %v811_v63 = vadd.f32 %v2435_v14, %v775_v29  ;;  %v813_v29 = vadd.f32 %v3337_v47, %v2625_v8 }
 0x159   : > { %v812_v55 = vadd.f32 %v2249_v46, %v782_v6  ;;  %3357 = vst [vmem:[#allocation14_spill] sm:$0xff] %v2717_v35 }
 0x15b   : > { %v2664_v0 = vadd.f32 %v839_v51, %v812_v55  ;;  %1010 = vrot.lane.b32.xlu0 %v2606_v36, %s1913_s6 }
 0x15c   : > { %1012 = vrot.lane.b32.xlu1 %v2623_v43, %s1913_s6 }
 0x15d   : > { %1018 = vrot.lane.b32.xlu2 %v2619_v15, %s1913_s6  ;;  %v785_v31 = vpop.permute.xlu0 %784 }
 0x15e   : > { %v787_v27 = vpop.permute.xlu1 %786  ;;  %v790_v42 = vadd.f32 %v785_v31, %v746_v48 }
 0x15f   : > { %v791_v2 = vadd.f32 %v787_v27, %v747_v54  ;;  %v851_v50 = vpop.permute.xlu2 %850 }
 0x160   : > { %v816_v6 = vadd.f32 %v2467_v25, %v790_v42 }
 0x161   : > { %v817_v23 = vadd.f32 %v2472_v57, %v791_v2 }
 0x163   : > { %v2679_v10 = vadd.f32 %v851_v50, %v817_v23  ;;  %1020 = vrot.lane.b32.xlu0 %v2629_v60, %s1913_s6 }
 0x164   : > { %1167 = vrot.lane.b32.xlu1 %v2677_v33, %s1912_s5 }
 0x165   : > { %1169 = vrot.lane.b32.xlu2 %v2682_v53, %s1912_s5  ;;  %v795_v57 = vpop.permute.xlu0 %794 }
 0x166   : > { %v801_v32 = vpop.permute.xlu1 %800  ;;  %v799_v62 = vadd.f32 %v795_v57, %v757_v26 }
 0x167   : > { %v806_v34 = vadd.f32 %v801_v32, %v766_v37  ;;  %v869_v41 = vpop.permute.xlu2 %868 }
 0x168   : > { %v821_v25 = vadd.f32 %v2497_v21, %v799_v62  ;;  %v2767_v62 = vld [vmem:[%s1992_s28 + $0x31] sm:$0xff] }
 0x169   : > { %v824_v49 = vadd.f32 %v2508_v39, %v806_v34  ;;  %v810_v39 = vadd.f32 %v2438_v5, %v2602_v30  ;;  %v2727_v30 = vmul.f32 %v2695_v45, %v2695_v45 }
 0x16b   : > { %v2704_v59 = vadd.f32 %v869_v41, %v824_v49  ;;  %1177 = vrot.lane.b32.xlu0 %v2698_v4, %s1912_s5 }
 0x16c   : > { %1179 = vrot.lane.b32.xlu1 %v2695_v45, %s1912_s5 }
 0x16d   : > { %1187 = vrot.lane.b32.xlu2 %v2702_v22, %s1912_s5  ;;  %v829_v19 = vpop.permute.xlu0 %828 }
 0x16e   : > { %v831_v24 = vpop.permute.xlu1 %830  ;;  %v834_v38 = vadd.f32 %v829_v19, %v810_v39 }
 0x16f   : > { %v835_v58 = vadd.f32 %v831_v24, %v811_v63  ;;  %v879_v40 = vpop.permute.xlu2 %878  ;;  %v2774_v24 = vld [vmem:[%s1992_s28 + $0x39] sm:$0xff] }
 0x171   : > { %v2723_v11 = vadd.f32 %v879_v40, %v835_v58  ;;  %v3358_v58 = vld [vmem:[#allocation16_spill] sm:$0xff]  ;;  %v3359_v40 = vld [vmem:[#allocation15_spill] sm:$0xff] }
 0x173   : > { %1189 = vrot.lane.b32.xlu0 %v2721_v13, %s1912_s5 }
 0x174   : > { %1197 = vrot.lane.b32.xlu1 %v2717_v35, %s1912_s5 }
 0x175   : > { %1199 = vrot.lane.b32.xlu2 %v2727_v30, %s1912_s5  ;;  %v841_v55 = vpop.permute.xlu0 %840 }
 0x176   : > { %v849_v51 = vpop.permute.xlu1 %848  ;;  %v845_v54 = vadd.f32 %v841_v55, %v813_v29  ;;  %v2791_v55 = vmul.f32 %v2767_v62, %v2767_v62 }
 0x177   : > { %v854_v48 = vadd.f32 %v849_v51, %v816_v6  ;;  %v893_v27 = vpop.permute.xlu2 %892 }
 0x178   : > { %3361 = vst [vmem:[#allocation25_spill] sm:$0xff] %v2791_v55 }
 0x179   : > { %v898_v31 = vadd.f32 %v893_v27, %v854_v48 }
 0x17b   : > { %v2739_v2 = vadd.f32 %v2600_v18, %v898_v31  ;;  %1215 = vrot.lane.b32.xlu0 %v2677_v33, %s1913_s6 }
 0x17c   : > { %1217 = vrot.lane.b32.xlu1 %v2682_v53, %s1913_s6 }
 0x17d   : > { %1223 = vrot.lane.b32.xlu2 %v2698_v4, %s1913_s6  ;;  %v859_v8 = vpop.permute.xlu0 %858 }
 0x17e   : > { %v861_v47 = vpop.permute.xlu1 %860  ;;  %v864_v50 = vadd.f32 %v859_v8, %v2642_v1  ;;  %v2809_v8 = vmul.f32 %v3359_v40, %v3359_v40 }
 0x17f   : > { %v865_v42 = vadd.f32 %v861_v47, %v821_v25  ;;  %v903_v23 = vpop.permute.xlu2 %902 }
 0x180   : > { %3363 = vst [vmem:[#allocation11_spill] sm:$0xff] %v2809_v8 }
 0x181   : > { %v907_v18 = vadd.f32 %v903_v23, %v865_v42 }
 0x183   : > { %v2750_v26 = vadd.f32 %v2623_v43, %v907_v18  ;;  %1225 = vrot.lane.b32.xlu0 %v2695_v45, %s1913_s6 }
 0x184   : > { %1231 = vrot.lane.b32.xlu1 %v2702_v22, %s1913_s6 }
 0x185   : > { %1233 = vrot.lane.b32.xlu2 %v2721_v13, %s1913_s6  ;;  %v871_v37 = vpop.permute.xlu0 %870 }
 0x186   : > { %v877_v21 = vpop.permute.xlu1 %876  ;;  %v875_v1 = vadd.f32 %v871_v37, %v2652_v44 }
 0x187   : > { %v882_v32 = vadd.f32 %v877_v21, %v834_v38  ;;  %v939_v57 = vpop.permute.xlu2 %938 }
 0x189   : > { %v920_v34 = vadd.f32 %v2562_v16, %v882_v32 }
 0x18b   : > { %v2760_v43 = vadd.f32 %v939_v57, %v920_v34  ;;  %1239 = vrot.lane.b32.xlu0 %v2717_v35, %s1913_s6 }
 0x18c   : > { %1241 = vrot.lane.b32.xlu1 %v2727_v30, %s1913_s6 }
 0x18d   : > { %1275 = vrot.lane.b32.xlu2 %v2767_v62, %s1912_s5  ;;  %v885_v49 = vpop.permute.xlu0 %884 }
 0x18e   : > { %v887_v41 = vpop.permute.xlu1 %886  ;;  %v890_v44 = vadd.f32 %v885_v49, %v2664_v0 }
 0x18f   : > { %v891_v63 = vadd.f32 %v887_v41, %v845_v54  ;;  %v951_v39 = vpop.permute.xlu2 %950  ;;  %v2796_v54 = vmul.f32 %v3358_v58, %v3358_v58 }
 0x190   : > { %v922_v23 = vadd.f32 %v2577_v20, %v890_v44  ;;  %v1840_v44 = vld [vmem:[%s1997_s4 + $0x1] sm:$0xff] }
 0x191   : > { %v923_v16 = vadd.f32 %v2583_v3, %v891_v63  ;;  %v2787_v3 = vmul.f32 %v2774_v24, %v2774_v24  ;;  %3362 = vst [vmem:[#allocation10_spill] sm:$0xff] %v2796_v54  ;;  %v1839_v63 = vld [vmem:[%s1992_s28 + $0x1] sm:$0xff] }
 0x193   : > { %v2776_v19 = vadd.f32 %v951_v39, %v923_v16  ;;  %1277 = vrot.lane.b32.xlu0 %v2774_v24, %s1912_s5  ;;  %3360 = vst [vmem:[#allocation17_spill] sm:$0xff] %v2787_v3  ;;  %v649_v39 = vsub.f32 %v1839_v63, %v1840_v44  ;;  %v3364_v16 = vld [vmem:[#allocation19_spill] sm:$0xff] }
 0x194   : > { %1285 = vrot.lane.b32.xlu1 %v3358_v58, %s1912_s5  ;;  %v2881_v63 = vld [vmem:[%s1997_s4 + $0x3a] sm:$0xff] }
 0x195   : > { %1287 = vrot.lane.b32.xlu2 %v3359_v40, %s1912_s5  ;;  %v895_v6 = vpop.permute.xlu0 %894 }
 0x196   : > { %v901_v38 = vpop.permute.xlu1 %900  ;;  %v899_v0 = vadd.f32 %v895_v6, %v2679_v10 }
 0x197   : > { %v906_v29 = vadd.f32 %v901_v38, %v864_v50  ;;  %v969_v51 = vpop.permute.xlu2 %968  ;;  %v651_v38 = vmul.f32 %v649_v39, %v3364_v16 }
 0x198   : > { %v927_v20 = vadd.f32 %v2596_v52, %v899_v0 }
 0x199   : > { %v930_v48 = vadd.f32 %v2606_v36, %v906_v29 }
 0x19b   : > { %v2798_v27 = vadd.f32 %v969_v51, %v930_v48  ;;  %1295 = vrot.lane.b32.xlu0 %v2791_v55, %s1912_s5 }
 0x19c   : > { %1297 = vrot.lane.b32.xlu1 %v2787_v3, %s1912_s5 }
 0x19d   : > { %1305 = vrot.lane.b32.xlu2 %v2796_v54, %s1912_s5  ;;  %v909_v31 = vpop.permute.xlu0 %908 }
 0x19e   : > { %v911_v10 = vpop.permute.xlu1 %910  ;;  %v914_v36 = vadd.f32 %v909_v31, %v2704_v59  ;;  %v921_v59 = vadd.f32 %v2580_v61, %v2723_v11  ;;  %v2852_v31 = vld [vmem:[%s1992_s28 + $0x32] sm:$0xff] }
 0x19f   : > { %v915_v25 = vadd.f32 %v911_v10, %v875_v1  ;;  %v981_v47 = vpop.permute.xlu2 %980  ;;  %v2849_v10 = vld [vmem:[%s1992_s28 + $0x3a] sm:$0xff] }
 0x1a0   : > { %v934_v52 = vadd.f32 %v2619_v15, %v914_v36  ;;  %v661_v15 = vmul.f32 %v2538_v12, %v651_v38  ;;  %v2889_v39 = vmul.f32 %v2849_v10, %v2849_v10 }
 0x1a1   : > { %v935_v42 = vadd.f32 %v2629_v60, %v915_v25  ;;  %v1551_v25 = vsub.f32 %v2767_v62, %v3358_v58 }
 0x1a2   : > { %3366 = vst [vmem:[#allocation20_spill] sm:$0xff] %v2889_v39 }
 0x1a3   : > { %v2812_v50 = vadd.f32 %v981_v47, %v935_v42  ;;  %1307 = vrot.lane.b32.xlu0 %v2809_v8, %s1912_s5 }
 0x1a4   : > { %1323 = vrot.lane.b32.xlu1 %v2767_v62, %s1913_s6 }
 0x1a5   : > { %1325 = vrot.lane.b32.xlu2 %v2774_v24, %s1913_s6  ;;  %v941_v21 = vpop.permute.xlu0 %940 }
 0x1a6   : > { %v949_v18 = vpop.permute.xlu1 %948  ;;  %v945_v37 = vadd.f32 %v941_v21, %v921_v59 }
 0x1a7   : > { %v954_v60 = vadd.f32 %v949_v18, %v922_v23  ;;  %v995_v32 = vpop.permute.xlu2 %994 }
 0x1a9   : > { %v1000_v1 = vadd.f32 %v995_v32, %v954_v60  ;;  %v2874_v60 = vmul.f32 %v2852_v31, %v2852_v31  ;;  %v1841_v32 = vld [vmem:[%s1992_s28 + $0x9] sm:$0xff]  ;;  %s1639_s28 = scalar_lea.hbm %s3281_s3, %s1763_s25 }
 0x1aa   : > { %s1643_s30 = sshll.u32 %s1639_s28, 4  ;;  %s1644_s30 = int_to_ptr.hbm [resolvable:$true] %s1643_s30 }
 0x1ab   : > { %1331 = vrot.lane.b32.xlu0 %v3358_v58, %s1913_s6  ;;  %v1553_v58 = vmul.f32 %v1551_v25, %v3364_v16  ;;  %v1028_v18 = vmul.f32 0.11111111, %v1000_v1  ;;  %3365 = vst [vmem:[#allocation27_spill] sm:$0xff] %v2874_v60 }
 0x1ac   : > { %1333 = vrot.lane.b32.xlu1 %v3359_v40, %s1913_s6 }
 0x1ad   : > { %1339 = vrot.lane.b32.xlu2 %v2791_v55, %s1913_s6  ;;  %v959_v11 = vpop.permute.xlu0 %958 }
 0x1ae   : > { %v961_v61 = vpop.permute.xlu1 %960  ;;  %v2831_v34 = vadd.f32 %v959_v11, %v2739_v2  ;;  %v1104_v2 = vsub.f32 %v2438_v5, %v2249_v46  ;;  %v2857_v5 = vld [vmem:[%s1997_s4 + $0x32] sm:$0xff]  ;;  %v1843_v11 = vld [vmem:[%s1997_s4 + $0x21] sm:$0xff] }
 0x1af   : > { %v965_v57 = vadd.f32 %v961_v61, %v927_v20  ;;  %v1005_v41 = vpop.permute.xlu2 %1004  ;;  %v1842_v20 = vld [vmem:[%s1997_s4 + $0x9] sm:$0xff] }
 0x1b0   : > { %v1106_v46 = vmul.f32 %v1104_v2, %v3364_v16  ;;  %v650_v61 = vsub.f32 %v1841_v32, %v1842_v20 }
 0x1b1   : > { %v1009_v49 = vadd.f32 %v1005_v41, %v965_v57  ;;  %v1105_v57 = vsub.f32 %v2435_v14, %v1843_v11  ;;  %v2928_v11 = vmul.f32 %v2857_v5, %v2857_v5 }
 0x1b2   : > { %v1108_v36 = vmul.f32 %v1106_v46, %v2538_v12 }
 0x1b3   : > { %1341 = vrot.lane.b32.xlu0 %v2787_v3, %s1913_s6  ;;  %v2885_v44 = vmul.f32 0.11111111, %v1009_v49  ;;  %3369 = vst [vmem:[#allocation6_spill] sm:$0xff] %v2928_v11 }
 0x1b4   : > { %1347 = vrot.lane.b32.xlu1 %v2796_v54, %s1913_s6  ;;  %v1112_v1 = vmul.f32 %v1108_v36, %v1108_v36 }
 0x1b5   : > { %1349 = vrot.lane.b32.xlu2 %v2809_v8, %s1913_s6  ;;  %v971_v6 = vpop.permute.xlu0 %970 }
 0x1b6   : > { %v979_v40 = vpop.permute.xlu1 %978  ;;  %v2846_v0 = vadd.f32 %v971_v6, %v2750_v26  ;;  %v665_v26 = vmul.f32 %v661_v15, %v661_v15  ;;  %v2904_v6 = vmul.f32 %v1028_v18, %v1028_v18  ;;  %v2909_v25 = vadd.f32 0.01, %v1112_v1 }
 0x1b7   : > { %v984_v29 = vadd.f32 %v979_v40, %v934_v52  ;;  %v1019_v51 = vpop.permute.xlu2 %1018  ;;  %v2894_v40 = vld [vmem:[%s1997_s4 + $0x39] sm:$0xff] }
 0x1b8   : > { %v1552_v14 = vsub.f32 %v2774_v24, %v2894_v40  ;;  %vm1123_vm12 = vcmp.eq.f32.partialorder %v2909_v25, inf  ;;  %vm1125_vm13 = vcmp.eq.f32.partialorder %v2909_v25, 0.0 }
 0x1b9   : > { %v1024_v48 = vadd.f32 %v1019_v51, %v984_v29  ;;  %v3367_v29 = vld [vmem:[#allocation18_spill] sm:$0xff] }
 0x1ba   : > { %v652_v51 = vmul.f32 %v650_v61, %v3367_v29  ;;  %v1107_v36 = vmul.f32 %v1105_v57, %v3367_v29 }
 0x1bb   : > { %1385 = vrot.lane.b32.xlu0 %v2852_v31, %s1912_s5  ;;  %v1042_v52 = vmul.f32 0.11111111, %v1024_v48 }
 0x1bc   : > { %1387 = vrot.lane.b32.xlu1 %v2849_v10, %s1912_s5  ;;  %v662_v57 = vmul.f32 %v2591_v17, %v652_v51 }
 0x1bd   : > { %1395 = vrot.lane.b32.xlu2 %v2857_v5, %s1912_s5  ;;  %v987_v42 = vpop.permute.xlu0 %986 }
 0x1be   : > { %v989_v47 = vpop.permute.xlu1 %988  ;;  %v992_v59 = vadd.f32 %v987_v42, %v2760_v43  ;;  %v2883_v43 = vadd.f32 0.01, %v665_v26  ;;  %v1555_v26 = vmul.f32 %v1553_v58, %v2538_v12  ;;  %v2924_v58 = vmul.f32 %v2881_v63, %v2881_v63 }
 0x1bf   : > { %v993_v23 = vadd.f32 %v989_v47, %v945_v37  ;;  %v2870_v21 = vpop.permute.xlu2 %1169 }
 0x1c0   : > { %v1026_v37 = vmul.f32 0.11111111, %v992_v59  ;;  %1819 = vrsqrt.f32 %v2883_v43  ;;  %3368 = vst [vmem:[#allocation5_spill] sm:$0xff] %v2924_v58  ;;  %vm676_vm10 = vcmp.eq.f32.partialorder %v2883_v43, inf  ;;  %vm678_vm11 = vcmp.eq.f32.partialorder %v2883_v43, 0.0 }
 0x1c1   : > { %v1027_v41 = vmul.f32 0.11111111, %v993_v23  ;;  %1821 = vrsqrt.f32 %v2909_v25 }
 0x1c2   : > { %v1044_v16 = vmul.f32 %v1028_v18, %v1026_v37  ;;  %v1048_v38 = vmul.f32 2.0, %v1026_v37  ;;  %v2902_v49 = vmul.f32 %v1026_v37, %v1026_v37 }
 0x1c3   : > { %v2891_v2 = vmul.f32 %v1027_v41, %v1027_v41  ;;  %1397 = vrot.lane.b32.xlu0 %v2881_v63, %s1912_s5  ;;  %v1049_v20 = vmul.f32 2.0, %v1027_v41 }
 0x1c4   : > { %1405 = vrot.lane.b32.xlu1 %v2874_v60, %s1912_s5  ;;  %v1046_v48 = vsub.f32 %v1042_v52, %v1044_v16  ;;  %v1050_v15 = vmul.f32 %v1048_v38, %v1028_v18  ;;  %v1060_v23 = vadd.f32 %v2904_v6, %v2902_v49 }
 0x1c5   : > { %v1035_v46 = vsub.f32 %v2885_v44, %v2891_v2  ;;  %1407 = vrot.lane.b32.xlu2 %v2889_v39, %s1912_s5  ;;  %v997_v42 = vpop.permute.xlu0 %996 }
 0x1c6   : > { %v1003_v47 = vpop.permute.xlu1 %1002  ;;  %v1054_v59 = vmul.f32 2.0, %v1046_v48  ;;  %v1001_v32 = vadd.f32 %v997_v42, %v2776_v19  ;;  %v1052_v61 = vadd.f32 0.0001, %v1050_v15  ;;  %v1109_v19 = vmul.f32 %v1107_v36, %v2591_v17 }
 0x1c7   : > { %v1008_v18 = vadd.f32 %v1003_v47, %v2831_v34  ;;  %v2920_v12 = vpop.permute.xlu2 %1187  ;;  %v1554_v34 = vmul.f32 %v1552_v14, %v3367_v29  ;;  %v1559_v15 = vmul.f32 %v1555_v26, %v1555_v26  ;;  %v2943_v14 = vpop.eup %1819  ;;  %v666_v29 = vmul.f32 %v662_v57, %v662_v57 }
 0x1c8   : > { %v1056_v37 = vadd.f32 0.0009, %v1054_v59  ;;  %v1029_v44 = vmul.f32 0.11111111, %v1001_v32  ;;  %v1113_v47 = vmul.f32 %v1109_v19, %v1109_v19  ;;  %v2957_v57 = vpop.eup %1821 }
 0x1c9   : > { %v1030_v1 = vmul.f32 0.11111111, %v1008_v18  ;;  %v2951_v32 = vadd.f32 0.01, %v1559_v15  ;;  %v1117_v19 = vmul.f32 %v2957_v57, %v2909_v25 }
 0x1ca   : > { %v2933_v52 = vmul.f32 %v1056_v37, %v1052_v61  ;;  %v2936_v38 = vmul.f32 %v1049_v20, %v1029_v44  ;;  %v1039_v48 = vmul.f32 %v1029_v44, %v1029_v44  ;;  %v1045_v51 = vmul.f32 %v1029_v44, %v1027_v41 }
 0x1cb   : > { %v1034_v16 = vsub.f32 %v1030_v1, %v2902_v49  ;;  %1415 = vrot.lane.b32.xlu0 %v2928_v11, %s1912_s5  ;;  %v1556_v49 = vmul.f32 %v1554_v34, %v2591_v17  ;;  %v2955_v20 = vadd.f32 0.01, %v666_v29  ;;  %v2959_v17 = vadd.f32 0.01, %v1113_v47 }
 0x1cc   : > { %1417 = vrot.lane.b32.xlu1 %v2924_v58, %s1912_s5  ;;  %v1061_v36 = vadd.f32 %v1039_v48, %v2891_v2  ;;  %v670_v1 = vmul.f32 %v2943_v14, %v2883_v43  ;;  %1823 = vrsqrt.f32 %v2951_v32  ;;  %vm1570_vm14 = vcmp.eq.f32.partialorder %v2951_v32, inf }
 0x1cd   : > { %1433 = vrot.lane.b32.xlu2 %v2852_v31, %s1913_s6  ;;  %v1011_v26 = vpop.permute.xlu0 %1010  ;;  %v1560_v37 = vmul.f32 %v1556_v49, %v1556_v49  ;;  %1825 = vrsqrt.f32 %v2955_v20  ;;  %vm1572_vm15 = vcmp.eq.f32.partialorder %v2951_v32, 0.0  ;;  %vm688_vm0 = vcmp.eq.f32.partialorder %v2955_v20, inf }
 0x1ce   : > { %v1013_v42 = vpop.permute.xlu1 %1012  ;;  %v1016_v18 = vadd.f32 %v1011_v26, %v2798_v27  ;;  %1827 = vrsqrt.f32 %v2959_v17  ;;  %v671_v47 = vmul.f32 %v2943_v14, %v670_v1  ;;  %v1063_v49 = vadd.f32 0.0001, %v1061_v36 }
 0x1cf   : > { %v1017_v59 = vadd.f32 %v1013_v42, %v2846_v0  ;;  %v2953_v41 = vpop.permute.xlu2 %1199  ;;  %v1118_v36 = vmul.f32 %v2957_v57, %v1117_v19  ;;  %vm1135_vm1 = vcmp.eq.f32.partialorder %v2959_v17, inf }
 0x1d0   : > { %v1036_v2 = vmul.f32 0.11111111, %v1016_v18 }
 0x1d1   : > { %v1037_v61 = vmul.f32 0.11111111, %v1017_v59 }
 0x1d2   : > { %v1040_v0 = vsub.f32 %v1036_v2, %v2904_v6  ;;  %v1062_v6 = vadd.f32 0.0001, %v1060_v23  ;;  %v2985_v23 = vpop.eup %1823 }
 0x1d3   : > { %v1041_v44 = vsub.f32 %v1037_v61, %v1039_v48  ;;  %1435 = vrot.lane.b32.xlu0 %v2849_v10, %s1913_s6  ;;  %v2973_v48 = vadd.f32 0.01, %v1560_v37  ;;  %v2988_v2 = vpop.eup %1825  ;;  %v672_v37 = vmul.f32 0.5, %v671_v47 }
 0x1d4   : > { %1441 = vrot.lane.b32.xlu1 %v2857_v5, %s1913_s6  ;;  %v1064_v34 = vadd.f32 %v1040_v0, %v1034_v16  ;;  %v2992_v1 = vpop.eup %1827 }
 0x1d5   : > { %v1065_v27 = vadd.f32 %v1041_v44, %v1035_v46  ;;  %1443 = vrot.lane.b32.xlu2 %v2881_v63, %s1913_s6  ;;  %v1021_v29 = vpop.permute.xlu0 %1020  ;;  %1829 = vrsqrt.f32 %v2973_v48 }
 0x1d6   : > { %v2975_v15 = vpop.permute.xlu1 %1167  ;;  %v1066_v46 = vadd.f32 0.0009, %v1064_v34  ;;  %v1025_v16 = vadd.f32 %v1021_v29, %v2812_v50  ;;  %v1564_v34 = vmul.f32 %v2985_v23, %v2951_v32  ;;  %v682_v29 = vmul.f32 %v2988_v2, %v2955_v20 }
 0x1d7   : > { %v1067_v42 = vadd.f32 0.0009, %v1065_v27  ;;  %v1224_v26 = vpop.permute.xlu2 %1223 }
 0x1d8   : > { %v2983_v18 = vmul.f32 %v1066_v46, %v1062_v6  ;;  %v1043_v61 = vmul.f32 0.11111111, %v1025_v16  ;;  %v673_v6 = vsub.f32 1.5, %v672_v37  ;;  %v3015_v16 = vmul.f32 %v2698_v4, %v2677_v33 }
 0x1d9   : > { %v2981_v59 = vmul.f32 %v1067_v42, %v1063_v49  ;;  %v1053_v49 = vadd.f32 0.0001, %v2936_v38 }
 0x1da   : > { %v1047_v50 = vsub.f32 %v1043_v61, %v1045_v51  ;;  %v3006_v51 = vmul.f32 0.5, %v1118_v36  ;;  %v1129_v61 = vmul.f32 %v2992_v1, %v2959_v17  ;;  %v1081_v8 = vand.u32 2147483648, %v2983_v18 }
 0x1db   : > { %1831 = vrcp.f32 %v2981_v59  ;;  %1449 = vrot.lane.b32.xlu0 %v2874_v60, %s1913_s6  ;;  %v3010_v47 = vpop.eup %1829  ;;  %vm1090_vm4 = vweird.f32 %v2981_v59  ;;  %vm1075_vm5 = vweird.f32 %v2983_v18 }
 0x1dc   : > { %1833 = vrcp.f32 %v2983_v18  ;;  %1451 = vrot.lane.b32.xlu1 %v2889_v39, %s1913_s6  ;;  %v1055_v44 = vmul.f32 2.0, %v1047_v50  ;;  %v3024_v39 = vmul.f32 %v2695_v45, %v2682_v53  ;;  %v1082_v35 = vor.u32 1.1754944e-38, %v1081_v8 }
 0x1dd   : > { %1457 = vrot.lane.b32.xlu2 %v2928_v11, %s1913_s6  ;;  %v1178_v27 = vpop.permute.xlu0 %1177 }
 0x1de   : > { %v2999_v0 = vpop.permute.xlu1 %1179  ;;  %v1183_v19 = vadd.f32 %v2698_v4, %v1178_v27  ;;  %v1057_v42 = vadd.f32 0.0009, %v1055_v44  ;;  %v1120_v44 = vsub.f32 1.5, %v3006_v51  ;;  %v1565_v4 = vmul.f32 %v2985_v23, %v1564_v34 }
 0x1df   : > { %v1234_v46 = vpop.permute.xlu2 %1233  ;;  %v1096_v34 = vand.u32 2147483648, %v2981_v59 }
 0x1e0   : > { %v3019_v37 = vadd.f32 %v1224_v26, %v1183_v19  ;;  %v1059_v60 = vmul.f32 %v1057_v42, %v1053_v49  ;;  %v3034_v26 = vmul.f32 %v2943_v14, %v673_v6  ;;  %v683_v19 = vmul.f32 %v2988_v2, %v682_v29 }
 0x1e1   : > { %v1832_v50 = vpop.eup %1831  ;;  %v1130_v49 = vmul.f32 %v2992_v1, %v1129_v61  ;;  %v3040_v42 = vmul.f32 %v2568_v56, %v2632_v28  ;;  %v1094_v14 = vand.u32 2147483647, %v2981_v59  ;;  %v1097_v54 = vor.u32 1.1754944e-38, %v1096_v34 }
 0x1e2   : > { %3370 = vst [vmem:[#allocation26_spill] sm:$0xff] %v3019_v37  ;;  %v1834_v36 = vpop.eup %1833  ;;  %v1086_v27 = vmul.f32 %v1832_v50, %v2981_v59  ;;  %vm1091_vm2 = vweird.f32 %v1832_v50  ;;  %v684_v3 = vmul.f32 0.5, %v683_v19  ;;  %v645_v59 = vmul.f32 %v2572_v9, %v2608_v7 }
 0x1e3   : > { %v1071_v38 = vmul.f32 %v1834_v36, %v2983_v18  ;;  %1459 = vrot.lane.b32.xlu0 %v2924_v58, %s1913_s6  ;;  %vm1076_vm3 = vweird.f32 %v1834_v36  ;;  %v1131_v37 = vmul.f32 0.5, %v1130_v49  ;;  %vm1092_vm6 = vmor %vm1090_vm4, %vm1091_vm2  ;;  %vm1095_vm7 = vcmp.eq.f32.partialorder %v1094_v14, 8.507059e+37 }
 0x1e4   : > { %v1087_v11 = vsub.f32 1.0, %v1086_v27  ;;  %1207 = vrot.lane.b32.xlu1 %v3015_v16, %s1912_s5  ;;  %v1576_v27 = vmul.f32 %v3010_v47, %v2973_v48  ;;  %vm1077_vm8 = vmor %vm1075_vm5, %vm1076_vm3  ;;  %v1174_v49 = vadd.f32 %v2682_v53, %v2870_v21  ;;  %v1173_v7 = vadd.f32 %v2677_v33, %v2975_v15 }
 0x1e5   : > { %v1072_v51 = vsub.f32 1.0, %v1071_v38  ;;  %1209 = vrot.lane.b32.xlu2 %v3024_v39, %s1912_s5  ;;  %v1190_v29 = vpop.permute.xlu0 %1189  ;;  %v1079_v38 = vand.u32 2147483647, %v2983_v18  ;;  %v647_v53 = vsub.f32 1.0, %v645_v59  ;;  %vm690_vm2 = vcmp.eq.f32.partialorder %v2955_v20, 0.0 }
 0x1e6   : > { %v1088_v58 = vmul.f32 %v1832_v50, %v1087_v11  ;;  %v3047_v6 = vpop.permute.xlu1 %1197  ;;  %v1194_v61 = vadd.f32 %v1190_v29, %v2721_v13  ;;  %v3059_v29 = vld [vmem:[%s1997_s4 + $0x31] sm:$0xff]  ;;  %v1577_v8 = vmul.f32 %v3010_v47, %v1576_v27  ;;  %v1132_v27 = vsub.f32 1.5, %v1131_v37 }
 0x1e7   : > { %3371 = vst [vmem:[#allocation7_spill] sm:$0xff] %v3047_v6  ;;  %v1073_v28 = vmul.f32 %v1834_v36, %v1072_v51  ;;  %v1276_v11 = vpop.permute.xlu2 %1275  ;;  %vm1080_vm9 = vcmp.eq.f32.partialorder %v1079_v38, 8.507059e+37  ;;  %v675_v37 = vmul.f32 %v3034_v26, %v2883_v43  ;;  %vm1137_vm3 = vcmp.eq.f32.partialorder %v2959_v17, 0.0 }
 0x1e8   : > { %v1089_v55 = vadd.f32 %v1832_v50, %v1088_v58  ;;  %v3056_v6 = vadd.f32 %v1234_v46, %v1194_v61  ;;  %v3063_v58 = vmul.f32 %v3059_v29, %v2767_v62  ;;  %v679_v61 = vand.u32 2147483648, %v2883_v43 }
 0x1e9   : > { %v1074_v51 = vadd.f32 %v1834_v36, %v1073_v28  ;;  %v1578_v28 = vmul.f32 0.5, %v1577_v8  ;;  %vm1582_vm4 = vcmp.eq.f32.partialorder %v2973_v48, inf  ;;  %vm1584_vm5 = vcmp.eq.f32.partialorder %v2973_v48, 0.0 }
 0x1ea   : > { %v1093_v13 = vsel %vm1092_vm6, %v1832_v50, %v1089_v55  ;;  %v1566_v55 = vmul.f32 0.5, %v1565_v4  ;;  %vm1599_vm6 = vcmask 130048  }
 0x1eb   : > { %v1098_v18 = vsel %vm1095_vm7, %v1097_v54, %v1093_v13  ;;  %v1078_v19 = vsel %vm1077_vm8, %v1834_v36, %v1074_v51  ;;  %1247 = vrot.lane.b32.xlu0 %v3015_v16, %s1913_s6  ;;  %v1121_v54 = vmul.f32 %v2957_v57, %v1120_v44  ;;  %v648_v36 = vsub.f32 1.0, %v3040_v42  ;;  %v3097_v51 = vld [vmem:[%s2295_s10 + $0x8] sm:$0xff] }
 0x1ec   : > { %v1099_v46 = vmul.f32 %v1098_v18, %v1059_v60  ;;  %1249 = vrot.lane.b32.xlu1 %v3024_v39, %s1913_s6  ;;  %v1083_v50 = vsel %vm1080_vm9, %v1082_v35, %v1078_v19  ;;  %v685_v35 = vsub.f32 1.5, %v684_v3  ;;  %v3090_v44 = vmul.f32 %v2894_v40, %v2774_v24 }
 0x1ed   : > { %v1084_v60 = vmul.f32 %v1083_v50, %v2933_v52  ;;  %1315 = vrot.lane.b32.xlu2 %v3063_v58, %s1912_s5  ;;  %v1216_v4 = vpop.permute.xlu0 %1215  ;;  %v1567_v42 = vsub.f32 1.5, %v1566_v55  ;;  %v664_v13 = vmul.f32 %v3097_v51, %v648_v36  ;;  %v1133_v18 = vmul.f32 %v2992_v1, %v1132_v27 }
 0x1ee   : > { %v1101_v34 = vmul.f32 %v1099_v46, %v2568_v56  ;;  %v1218_v14 = vpop.permute.xlu1 %1217  ;;  %v1221_v33 = vadd.f32 %v1216_v4, %v1173_v7  ;;  %v686_v59 = vmul.f32 %v2988_v2, %v685_v35  ;;  %v3104_v46 = vld [vmem:[%s2295_s10] sm:$0xff]  ;;  %v1122_v55 = vmul.f32 %v1121_v54, %v2909_v25 }
 0x1ef   : > { %v3084_v21 = vadd.f32 %v1218_v14, %v1174_v49  ;;  %v1100_v52 = vmul.f32 %v1084_v60, %v2572_v9  ;;  %v1288_v15 = vpop.permute.xlu2 %1287  ;;  %v1568_v2 = vmul.f32 %v2985_v23, %v1567_v42  ;;  %v1579_v1 = vsub.f32 1.5, %v1578_v28 }
 0x1f0   : > { %v1103_v57 = vsub.f32 1.0, %v1101_v34  ;;  %v1257_v3 = vadd.f32 %v2767_v62, %v1221_v33  ;;  %v663_v62 = vmul.f32 %v3104_v46, %v647_v53  ;;  %v1193_v49 = vadd.f32 %v2920_v12, %v2702_v22 }
 0x1f1   : > { %v1102_v38 = vsub.f32 1.0, %v1100_v52  ;;  %v1126_v23 = vand.u32 2147483648, %v2909_v25  ;;  %v687_v36 = vmul.f32 %v686_v59, %v2955_v20  ;;  %v1134_v22 = vmul.f32 %v1133_v18, %v2959_v17 }
 0x1f2   : > { %v1111_v19 = vmul.f32 %v3097_v51, %v1103_v57  ;;  %v3108_v26 = vadd.f32 %v1276_v11, %v1257_v3  ;;  %v1184_v11 = vadd.f32 %v2695_v45, %v2999_v0  ;;  %v677_v45 = vsel %vm676_vm10, %v2883_v43, %v675_v37 }
 0x1f3   : > { %v1110_v8 = vmul.f32 %v3104_v46, %v1102_v38  ;;  %1317 = vrot.lane.b32.xlu0 %v3090_v44, %s1912_s5  ;;  %v1124_v0 = vsel %vm1123_vm12, %v2909_v25, %v1122_v55  ;;  %v3140_v4 = vmul.f32 %v2881_v63, %v2849_v10  ;;  %v3144_v35 = vmul.f32 %v2857_v5, %v2852_v31  ;;  %v3373_v38 = vld [vmem:[#allocation7_spill] sm:$0xff] }
 0x1f4   : > { %1355 = vrot.lane.b32.xlu1 %v3063_v58, %s1913_s6  ;;  %v3117_v50 = vadd.f32 %v1111_v19, %v664_v13  ;;  %v1569_v27 = vmul.f32 %v1568_v2, %v2951_v32  ;;  %v1580_v53 = vmul.f32 %v3010_v47, %v1579_v1  ;;  %v680_v52 = vsel %vm678_vm11, %v679_v61, %v677_v45  ;;  %v3372_v61 = vld [vmem:[#allocation14_spill] sm:$0xff] }
 0x1f5   : > { %v3124_v7 = vadd.f32 %v1110_v8, %v663_v62  ;;  %1357 = vrot.lane.b32.xlu2 %v3090_v44, %s1913_s6  ;;  %v1226_v60 = vpop.permute.xlu0 %1225  ;;  %v1573_v57 = vand.u32 2147483648, %v2951_v32  ;;  %v689_v42 = vsel %vm688_vm0, %v2955_v20, %v687_v36  ;;  %v1136_v28 = vsel %vm1135_vm1, %v2959_v17, %v1134_v22  ;;  %v3374_v1 = vld [vmem:[#allocation10_spill] sm:$0xff] }
 0x1f6   : > { %v1232_v54 = vpop.permute.xlu1 %1231  ;;  %v1230_v34 = vadd.f32 %v1226_v60, %v1184_v11  ;;  %v1127_v47 = vsel %vm1125_vm13, %v1126_v23, %v1124_v0  ;;  %v1138_v3 = vand.u32 2147483648, %v2959_v17  ;;  %v1571_v43 = vsel %vm1570_vm14, %v2951_v32, %v1569_v27  ;;  %v3375_v36 = vld [vmem:[#allocation26_spill] sm:$0xff] }
 0x1f7   : > { %v1237_v12 = vadd.f32 %v1232_v54, %v1193_v49  ;;  %v1306_v14 = vpop.permute.xlu2 %1305  ;;  %v1581_v25 = vmul.f32 %v1580_v53, %v2973_v48  ;;  %v1203_v13 = vadd.f32 %v3373_v38, %v3372_v61  ;;  %v1140_v55 = vadd.f32 %v1127_v47, %v680_v52 }
 0x1f8   : > { %v1260_v33 = vadd.f32 %v2894_v40, %v1230_v34  ;;  %v691_v40 = vand.u32 2147483648, %v2955_v20  ;;  %v1139_v18 = vsel %vm1137_vm3, %v1138_v3, %v1136_v28  ;;  %v1574_v17 = vsel %vm1572_vm15, %v1573_v57, %v1571_v43  ;;  %v3377_v57 = vld [vmem:[#allocation25_spill] sm:$0xff] }
 0x1f9   : > { %v1585_v11 = vand.u32 2147483648, %v2973_v48  ;;  %v1587_v54 = vadd.f32 %v1574_v17, %v1140_v55  ;;  %v1259_v22 = vadd.f32 %v3059_v29, %v3375_v36  ;;  %v1258_v34 = vadd.f32 %v2774_v24, %v3084_v21  ;;  %v3378_v21 = vld [vmem:[#allocation11_spill] sm:$0xff]  ;;  %v3379_v36 = vld [vmem:[#allocation6_spill] sm:$0xff] }
 0x1fa   : > { %v3161_v37 = vadd.f32 %v1288_v15, %v1260_v33  ;;  %v1204_v15 = vadd.f32 %v2953_v41, %v2727_v30  ;;  %v692_v59 = vsel %vm690_vm2, %v691_v40, %v689_v42  ;;  %v1583_v41 = vsel %vm1582_vm4, %v2973_v48, %v1581_v25  ;;  %v3376_v33 = vld [vmem:[#allocation17_spill] sm:$0xff] }
 0x1fb   : > { %1425 = vrot.lane.b32.xlu0 %v3144_v35, %s1912_s5  ;;  %v1141_v30 = vadd.f32 %v1139_v18, %v692_v59  ;;  %v1586_v60 = vsel %vm1584_vm5, %v1585_v11, %v1583_v41  ;;  %v1264_v52 = vadd.f32 %v3376_v33, %v3056_v6  ;;  %v1263_v42 = vadd.f32 %v3377_v57, %v1237_v12 }
 0x1fc   : > { %1427 = vrot.lane.b32.xlu1 %v3140_v4, %s1912_s5 }
 0x1fd   : > { %1465 = vrot.lane.b32.xlu2 %v3144_v35, %s1913_s6  ;;  %v1240_v62 = vpop.permute.xlu0 %1239  ;;  %v1588_v32 = vadd.f32 %v1586_v60, %v1141_v30 }
 0x1fe   : > { %v1242_v19 = vpop.permute.xlu1 %1241  ;;  %v1245_v20 = vadd.f32 %v1240_v62, %v1203_v13 }
 0x1ff   : > { %v1246_v8 = vadd.f32 %v1242_v19, %v1204_v15  ;;  %v1326_v2 = vpop.permute.xlu2 %1325 }
 0x200   : > { %v1267_v49 = vadd.f32 %v3374_v1, %v1245_v20 }
 0x201   : > { %v1268_v43 = vadd.f32 %v3378_v21, %v1246_v8 }
 0x202   : > { %v1311_v23 = vadd.f32 %v1306_v14, %v1267_v49 }
 0x203   : > { %1467 = vrot.lane.b32.xlu0 %v3140_v4, %s1913_s6  ;;  %s1862_s6 = sshra.s32 %s1644_s30, 4  ;;  %s1863_s6 = int_to_ptr.hbm [resolvable:$true] %s1862_s6 }
 0x204   : > { %1593 = vrot.lane.b32.xlu1 %v1587_v54, %s1912_s5  ;;  %s1864_s7 = scalar_lea.hbm %s1863_s6, 2  ;;  %p1869_p0 = scmp.lt.s32.totalorder %s1863_s6, %s3281_s3 }
 0x205   : > { %1595 = vrot.lane.b32.xlu2 %v1588_v32, %s1912_s5  ;;  %v1278_v0 = vpop.permute.xlu0 %1277  ;;  %s1629_s5 = scalar_lea.sflag [#allocation3], %s191_s17  ;;  %p1865_p11 = scmp.ne.s32.totalorder %s1863_s6, %s1864_s7 }
 0x206   : > { %v1286_v45 = vpop.permute.xlu1 %1285  ;;  %v1282_v48 = vadd.f32 %v1278_v0, %v1258_v34  ;;  %p1870_p1 = scmp.lt.s32.totalorder %s1868_s9, %s1864_s7 }
 0x207   : > { %v1291_v27 = vadd.f32 %v1286_v45, %v1259_v22  ;;  %v1340_v53 = vpop.permute.xlu2 %1339  ;;  %p1866_p12 = pnand %p1865_p11, %p1974_p5 }
 0x208   : > { %v1330_v14 = vadd.f32 %v1326_v2, %v1282_v48  ;;  %p1871_p2 = por %p1870_p1, %p1869_p0 }
 0x209   : > { %p1867_p13 = pneg %p1866_p12 }
 0x20b   : > { %p1872_p3 = pnand %p1871_p2, %p1867_p13 }
 0x20d   : > { %v1296_v47 = vpop.permute.xlu0 %1295 }
 0x20e   : > { %v1298_v28 = vpop.permute.xlu1 %1297  ;;  %v1301_v29 = vadd.f32 %v1296_v47, %v1263_v42  ;;  %v3380_v47 = vld [vmem:[#allocation20_spill] sm:$0xff] }
 0x20f   : > { %v1302_v40 = vadd.f32 %v1298_v28, %v1264_v52  ;;  %v3197_v3 = vpop.permute.xlu2 %1349 }
 0x210   : > { %v1345_v24 = vadd.f32 %v1340_v53, %v1301_v29  ;;  %v1368_v53 = vadd.f32 %v2849_v10, %v1330_v14 }
 0x215   : > { %v1308_v15 = vpop.permute.xlu0 %1307 }
 0x216   : > { %v1324_v25 = vpop.permute.xlu1 %1323  ;;  %v1312_v38 = vadd.f32 %v1308_v15, %v1268_v43  ;;  %v3381_v15 = vld [vmem:[#allocation27_spill] sm:$0xff] }
 0x217   : > { %v1329_v61 = vadd.f32 %v1324_v25, %v3108_v26  ;;  %v1396_v13 = vpop.permute.xlu2 %1395 }
 0x219   : > { %v1367_v8 = vadd.f32 %v2852_v31, %v1329_v61  ;;  %v1373_v61 = vadd.f32 %v3381_v15, %v1345_v24 }
 0x21d   : > { %v1332_v18 = vpop.permute.xlu0 %1331 }
 0x21e   : > { %v1334_v59 = vpop.permute.xlu1 %1333  ;;  %v1337_v49 = vadd.f32 %v1332_v18, %v1291_v27 }
 0x21f   : > { %v1408_v6 = vpop.permute.xlu2 %1407  ;;  %v1338_v41 = vadd.f32 %v1334_v59, %v3161_v37 }
 0x220   : > { %v1369_v34 = vadd.f32 %v2857_v5, %v1337_v49 }
 0x221   : > { %v1370_v11 = vadd.f32 %v2881_v63, %v1338_v41 }
 0x222   : > { %v1401_v27 = vadd.f32 %v1396_v13, %v1369_v34 }
 0x225   : > { %v1342_v12 = vpop.permute.xlu0 %1341 }
 0x226   : > { %v1348_v19 = vpop.permute.xlu1 %1347  ;;  %v1346_v37 = vadd.f32 %v1342_v12, %v1302_v40 }
 0x227   : > { %v1434_v62 = vpop.permute.xlu2 %1433  ;;  %v1353_v1 = vadd.f32 %v1348_v19, %v1311_v23 }
 0x228   : > { %v1374_v29 = vadd.f32 %v3380_v47, %v1346_v37 }
 0x229   : > { %v1377_v22 = vadd.f32 %v3379_v36, %v1353_v1 }
 0x22a   : > { %v1412_v12 = vadd.f32 %v1408_v6, %v1374_v29 }
 0x22d   : > { %v1386_v20 = vpop.permute.xlu0 %1385 }
 0x22e   : > { %v1388_v55 = vpop.permute.xlu1 %1387  ;;  %v1391_v26 = vadd.f32 %v1386_v20, %v1367_v8 }
 0x22f   : > { %v1444_v30 = vpop.permute.xlu2 %1443  ;;  %v1392_v31 = vadd.f32 %v1388_v55, %v1368_v53 }
 0x230   : > { %v1439_v45 = vadd.f32 %v1434_v62, %v1391_v26  ;;  %v1354_v26 = vadd.f32 %v3197_v3, %v1312_v38 }
 0x232   : > { %v1473_v23 = vmul.f32 0.11111111, %v1439_v45 }
 0x234   : > { %v1495_v5 = vmul.f32 2.0, %v1473_v23  ;;  %v1479_v10 = vmul.f32 %v1473_v23, %v1473_v23 }
 0x235   : > { %v1398_v2 = vpop.permute.xlu0 %1397 }
 0x236   : > { %v1406_v17 = vpop.permute.xlu1 %1405  ;;  %v1402_v32 = vadd.f32 %v1398_v2, %v1370_v11 }
 0x237   : > { %v1458_v0 = vpop.permute.xlu2 %1457  ;;  %v1411_v2 = vadd.f32 %v1406_v17, %v1373_v61 }
 0x238   : > { %v1448_v33 = vadd.f32 %v1444_v30, %v1402_v32 }
 0x23a   : > { %v1476_v21 = vmul.f32 0.11111111, %v1448_v33 }
 0x23c   : > { %v1486_v55 = vmul.f32 %v1476_v21, %v1476_v21 }
 0x23d   : > { %v1416_v60 = vpop.permute.xlu0 %1415 }
 0x23e   : > { %v1418_v54 = vpop.permute.xlu1 %1417  ;;  %v1421_v48 = vadd.f32 %v1416_v60, %v1377_v22  ;;  %v3382_v22 = vld [vmem:[#allocation5_spill] sm:$0xff] }
 0x23f   : > { %v1210_v14 = vpop.permute.xlu2 %1209  ;;  %v1378_v6 = vadd.f32 %v3382_v22, %v1354_v26 }
 0x240   : > { %v1463_v52 = vadd.f32 %v1458_v0, %v1421_v48 }
 0x241   : > { %v1422_v0 = vadd.f32 %v1418_v54, %v1378_v6  ;;  %v1214_v54 = vadd.f32 %v1210_v14, %v3024_v39 }
 0x242   : > { %v1483_v59 = vmul.f32 0.11111111, %v1463_v52 }
 0x245   : > { %v1436_v63 = vpop.permute.xlu0 %1435 }
 0x246   : > { %v1442_v57 = vpop.permute.xlu1 %1441  ;;  %v1440_v28 = vadd.f32 %v1436_v63, %v1392_v31 }
 0x247   : > { %v1447_v42 = vadd.f32 %v1442_v57, %v1401_v27  ;;  %v1316_v48 = vpop.permute.xlu2 %1315 }
 0x248   : > { %v1474_v25 = vmul.f32 0.11111111, %v1440_v28 }
 0x249   : > { %v1475_v43 = vmul.f32 0.11111111, %v1447_v42 }
 0x24a   : > { %v1496_v19 = vmul.f32 2.0, %v1474_v25  ;;  %v1480_v62 = vmul.f32 %v1474_v25, %v1474_v25  ;;  %v3213_v20 = vmul.f32 %v1476_v21, %v1474_v25 }
 0x24b   : > { %v1485_v40 = vmul.f32 %v1475_v43, %v1475_v43  ;;  %v3209_v18 = vmul.f32 %v1475_v43, %v1473_v23  ;;  %v3211_v13 = vmul.f32 %v1495_v5, %v1475_v43 }
 0x24c   : > { %v3215_v30 = vmul.f32 %v1496_v19, %v1476_v21  ;;  %v1508_v49 = vadd.f32 %v1486_v55, %v1480_v62 }
 0x24d   : > { %v1487_v41 = vsub.f32 %v1483_v59, %v1485_v40  ;;  %v1507_v8 = vadd.f32 %v1485_v40, %v1479_v10  ;;  %v1450_v1 = vpop.permute.xlu0 %1449 }
 0x24e   : > { %v1452_v24 = vpop.permute.xlu1 %1451  ;;  %v1455_v60 = vadd.f32 %v1450_v1, %v1411_v2  ;;  %v1510_v47 = vadd.f32 0.0001, %v1508_v49 }
 0x24f   : > { %v1456_v11 = vadd.f32 %v1452_v24, %v1412_v12  ;;  %v1509_v33 = vadd.f32 0.0001, %v1507_v8  ;;  %v1358_v28 = vpop.permute.xlu2 %1357 }
 0x250   : > { %v1477_v36 = vmul.f32 0.11111111, %v1455_v60 }
 0x251   : > { %v1478_v32 = vmul.f32 0.11111111, %v1456_v11 }
 0x252   : > { %v1481_v45 = vsub.f32 %v1477_v36, %v1479_v10 }
 0x253   : > { %v1482_v34 = vsub.f32 %v1478_v32, %v1480_v62 }
 0x254   : > { %v1511_v17 = vadd.f32 %v1487_v41, %v1481_v45 }
 0x255   : > { %v1460_v37 = vpop.permute.xlu0 %1459 }
 0x256   : > { %v1208_v53 = vpop.permute.xlu1 %1207  ;;  %v1513_v31 = vadd.f32 0.0009, %v1511_v17  ;;  %v1464_v23 = vadd.f32 %v1460_v37, %v1422_v0 }
 0x257   : > { %v1213_v3 = vadd.f32 %v1208_v53, %v3015_v16  ;;  %v1466_v40 = vpop.permute.xlu2 %1465 }
 0x258   : > { %v1515_v27 = vmul.f32 %v1513_v31, %v1509_v33  ;;  %v1484_v52 = vmul.f32 0.11111111, %v1464_v23  ;;  %v1499_v33 = vadd.f32 0.0001, %v3211_v13 }
 0x25a   : > { %v1488_v38 = vsub.f32 %v1484_v52, %v1486_v55  ;;  %1835 = vrcp.f32 %v1515_v27  ;;  %vm1522_vm8 = vweird.f32 %v1515_v27  ;;  %v1526_v6 = vand.u32 2147483647, %v1515_v27 }
 0x25c   : > { %v1512_v57 = vadd.f32 %v1488_v38, %v1482_v34  ;;  %v1528_v34 = vand.u32 2147483648, %v1515_v27  ;;  %vm1527_vm10 = vcmp.eq.f32.partialorder %v1526_v6, 8.507059e+37 }
 0x25d   : > { %v1248_v42 = vpop.permute.xlu0 %1247 }
 0x25e   : > { %v1250_v63 = vpop.permute.xlu1 %1249  ;;  %v1514_v29 = vadd.f32 0.0009, %v1512_v57  ;;  %v1253_v21 = vadd.f32 %v1248_v42, %v1213_v3 }
 0x25f   : > { %v1254_v25 = vadd.f32 %v1250_v63, %v1214_v54  ;;  %v1596_v26 = vpop.permute.xlu2 %1595 }
 0x260   : > { %v3221_v43 = vmul.f32 %v1514_v29, %v1510_v47  ;;  %v1271_v5 = vadd.f32 %v3063_v58, %v1253_v21  ;;  %v1836_v15 = vpop.eup %1835  ;;  %v1500_v47 = vadd.f32 0.0001, %v3215_v30 }
 0x261   : > { %v1518_v10 = vmul.f32 %v1836_v15, %v1515_v27  ;;  %v1272_v12 = vadd.f32 %v3090_v44, %v1254_v25  ;;  %vm1523_vm7 = vweird.f32 %v1836_v15 }
 0x262   : > { %1837 = vrcp.f32 %v3221_v43  ;;  %v1321_v59 = vadd.f32 %v1316_v48, %v1271_v5  ;;  %vm1524_vm9 = vmor %vm1522_vm8, %vm1523_vm7  ;;  %v1543_v63 = vand.u32 2147483648, %v3221_v43  ;;  %vm1537_vm12 = vweird.f32 %v3221_v43 }
 0x263   : > { %v1519_v2 = vsub.f32 1.0, %v1518_v10 }
 0x264   : > { %v1544_v5 = vor.u32 1.1754944e-38, %v1543_v63 }
 0x265   : > { %v1318_v61 = vpop.permute.xlu0 %1317  ;;  %v1520_v1 = vmul.f32 %v1836_v15, %v1519_v2 }
 0x266   : > { %v1356_v16 = vpop.permute.xlu1 %1355  ;;  %v1322_v62 = vadd.f32 %v1318_v61, %v1272_v12 }
 0x267   : > { %v1361_v19 = vadd.f32 %v1356_v16, %v1321_v59  ;;  %v1521_v36 = vadd.f32 %v1836_v15, %v1520_v1 }
 0x268   : > { %v1838_v55 = vpop.eup %1837  ;;  %v1362_v8 = vadd.f32 %v1358_v28, %v1322_v62  ;;  %v1541_v28 = vand.u32 2147483647, %v3221_v43 }
 0x269   : > { %v1381_v39 = vadd.f32 %v3144_v35, %v1361_v19  ;;  %v1533_v58 = vmul.f32 %v1838_v55, %v3221_v43  ;;  %v1601_v35 = vsel %vm1599_vm6, %v1596_v26, 0.0  ;;  %v1525_v31 = vsel %vm1524_vm9, %v1836_v15, %v1521_v36 }
 0x26a   : > { %v1382_v11 = vadd.f32 %v3140_v4, %v1362_v8  ;;  %vm1538_vm11 = vweird.f32 %v1838_v55  ;;  %vm1542_vm14 = vcmp.eq.f32.partialorder %v1541_v28, 8.507059e+37 }
 0x26b   : > { %v1534_v32 = vsub.f32 1.0, %v1533_v58  ;;  %vm1539_vm13 = vmor %vm1537_vm12, %vm1538_vm11 }
 0x26d   : > { %v1426_v41 = vpop.permute.xlu0 %1425  ;;  %v1535_v17 = vmul.f32 %v1838_v55, %v1534_v32 }
 0x26e   : > { %v1428_v14 = vpop.permute.xlu1 %1427  ;;  %v1431_v24 = vadd.f32 %v1426_v41, %v1381_v39 }
 0x26f   : > { %v1432_v44 = vadd.f32 %v1428_v14, %v1382_v11  ;;  %v1536_v38 = vadd.f32 %v1838_v55, %v1535_v17 }
 0x270   : > { %v1471_v49 = vadd.f32 %v1466_v40, %v1431_v24 }
 0x271   : > { %v1540_v29 = vsel %vm1539_vm13, %v1838_v55, %v1536_v38 }
 0x272   : > { %v1489_v60 = vmul.f32 0.11111111, %v1471_v49  ;;  %v1545_v15 = vsel %vm1542_vm14, %v1544_v5, %v1540_v29 }
 0x274   : > { %v1493_v22 = vsub.f32 %v1489_v60, %v3209_v18  ;;  %v1529_v18 = vor.u32 1.1754944e-38, %v1528_v34 }
 0x275   : > { %v1468_v45 = vpop.permute.xlu0 %1467 }
 0x276   : > { %v1594_v0 = vpop.permute.xlu1 %1593  ;;  %v1501_v48 = vmul.f32 2.0, %v1493_v22  ;;  %v1472_v53 = vadd.f32 %v1468_v45, %v1432_v44  ;;  %v1530_v57 = vsel %vm1527_vm10, %v1529_v18, %v1525_v31 }
 0x277   : > { %v1600_v37 = vsel %vm1599_vm6, %v1594_v0, 0.0 }
 0x278   : > { %v1602_v4 = vadd.f32 %v1601_v35, %v1600_v37  ;;  %v1503_v23 = vadd.f32 0.0009, %v1501_v48  ;;  %v1490_v52 = vmul.f32 0.11111111, %v1472_v53 }
 0x27a   : > { %1603 = vadd.xlane.f32.xlu0 %v1602_v4  ;;  %v1505_v3 = vmul.f32 %v1503_v23, %v1499_v33  ;;  %v1494_v27 = vsub.f32 %v1490_v52, %v3213_v20 }
 0x27c   : > { %v1531_v42 = vmul.f32 %v1530_v57, %v1505_v3  ;;  %v1502_v13 = vmul.f32 2.0, %v1494_v27 }
 0x27e   : > { %v1504_v21 = vadd.f32 0.0009, %v1502_v13  ;;  %v1547_v54 = vmul.f32 %v1531_v42, %v2572_v9 }
 0x280   : > { %v1506_v25 = vmul.f32 %v1504_v21, %v1500_v47  ;;  %v1549_v20 = vsub.f32 1.0, %v1547_v54 }
 0x282   : > { %v1546_v16 = vmul.f32 %v1545_v15, %v1506_v25  ;;  %v1557_v61 = vmul.f32 %v3104_v46, %v1549_v20 }
 0x284   : > { %v1548_v59 = vmul.f32 %v1546_v16, %v2568_v56  ;;  %v1589_v43 = vadd.f32 %v1557_v61, %v3124_v7 }
 0x286   : > { %v1550_v10 = vsub.f32 1.0, %v1548_v59  ;;  %v1612_v19 = vsel %vm1599_vm6, %v1589_v43, 0.0 }
 0x288   : > { %v1558_v40 = vmul.f32 %v3097_v51, %v1550_v10 }
 0x28a   : > { %v1590_v30 = vadd.f32 %v1558_v40, %v3117_v50 }
 0x28c   : > { %v1613_v9 = vsel %vm1599_vm6, %v1590_v30, 0.0 }
 0x28d   : > { %v1614_v12 = vadd.f32 %v1613_v9, %v1612_v19 }
 0x28f   : > { %1615 = vadd.xlane.f32.xlu1 %v1614_v12 }
 0x2ed   : > { %v1604_v62 = vpop.xlane.xlu0 %1603 }
 0x2ee   : > { %v1605_v55 = vrot.slane %v1604_v62, 4 }
 0x2f0   : > { %v1606_v2 = vadd.f32 %v1605_v55, %v1604_v62 }
 0x2f2   : > { %v1607_v46 = vrot.slane %v1606_v2, 2 }
 0x2f4   : > { %v1608_v39 = vadd.f32 %v1607_v46, %v1606_v2 }
 0x2f6   : > { %v1609_v56 = vrot.slane %v1608_v39, 1 }
 0x2f8   : > { %v1610_v14 = vadd.f32 %v1609_v56, %v1608_v39 }
 0x2fa   : > { %1768 = vpush %v1610_v14 }
 0x302   : > { %v1616_v7 = vpop.xlane.xlu1 %1615 }
 0x303   : > { %v1617_v51 = vrot.slane %v1616_v7, 4 }
 0x305   : > { %v1618_v41 = vadd.f32 %v1617_v51, %v1616_v7 }
 0x307   : > { %v1619_v50 = vrot.slane %v1618_v41, 2 }
 0x309   : > { %v1620_v58 = vadd.f32 %v1619_v50, %v1618_v41 }
 0x30b   : > { %v1621_v8 = vrot.slane %v1620_v58, 1 }
 0x30d   : > { %v1622_v24 = vadd.f32 %v1621_v8, %v1620_v58 }
 0x30f   : > { %1770 = vpush %v1622_v24 }
 0x32b   : > { %s1769_s20 = spop %1768 }
 0x32c   : > { %v1624_v1 = vstv %s1769_s20 }
 0x32d   : > { %1625 = vst [vmem:[%s193_s24] sm:$0x1] %v1624_v1 }
 0x340   : > { %s1771_s4 = spop %1770 }
 0x341   : > { %v1626_v49 = vstv %s1771_s4 }
 0x342   : > { %1627 = vst [vmem:[%s193_s24 + $0x1] sm:$0x1] %v1626_v49 }
 0x343   : > { %1875 = shalt.err (!%p1872_p3)
}
 0x344   : > { %1772 = dma.vmem_to_hbm [thread:$0]  (%p1974_p5), %s1642_s29, 32, %s1644_s30, %s1629_s5  }
 0x345 PF: > { %p1778_p4 = scmp.ge.s32.totalorder %s1910_s15, 2  ;;  %s1655_s17 = sand.u32 1, %s1898_s12  }
 0x346   : > { %s1656_s19 = scalar_lea.sflag [#allocation3], %s1655_s17 }
 0x347   : > { %p1775_p7 = pnand %p1778_p4, %p1978_p6 }
 0x349   : > { %p1776_p8 = pneg %p1775_p7 }
 0x34b   : > { %1893 = dma.done.wait (%p1776_p8), %s1656_s19, 32  }
 0x34c   : > { %1895 = vsyncadd (%p1776_p8), %s1656_s19, 4294967264  ;;  %p13_p9 = scmp.ge.s32.totalorder %s1961_s18, 4   ;;  %s3383_s12 = smov %s1902_s13 }
 0x34d   : > { %s3384_s13 = smov %s1906_s14  ;;  %s3385_s14 = smov %s1972_s21 }
 0x34e   : > { %s3386_s15 = smov %s1961_s18  ;;  %15 = sbr.rel (!%p13_p9) target bundleno = 3 (0x3), region = 77 }
 0x353   :  { %1662 = vsyncpa [#allocation3], 1 }
 0x354   :  { %1664 = vsyncpa [#allocation3 + $0x1], 1 }

</bundles_post_ra>
